<compile_context>
chip_gen: v6e
topology: v6e:2x2x1
jax: 0.10.0
libtpu: 0.0.40
codegen_flags: <defaults>
</compile_context>

<pallas_src>
import functools

import jax
import jax.numpy as jnp
from jax.experimental import pallas as pl
from jax.experimental.pallas import tpu as pltpu


# Zero/carry prefix rows in the conv pad scratches.  16 rows = one full bf16
# sublane tile, so the current data block always starts tile-aligned.
PAD = 16


# ----------------------------- Pallas kernel ------------------------------- #
def _audio_encoder_kernel(
    lens_ref,      # SMEM (B,) int32    scalar-prefetched valid lengths
    speech_ref,    # (1, TB, F)         raw speech features (native dtype)
    we_ref,        # (F, C)     bf16    stand-in encoder projection
    be_ref,        # (1, C)     f32
    w1_ref,        # (K*C, 2C)  bf16    conv1d1, taps flattened into reduction dim
    s1_ref,        # (1, 2C)    f32     folded BN1 scale
    t1_ref,        # (1, 2C)    f32     folded BN1 shift (includes conv bias)
    w2_ref,        # (K*2C, 4C) bf16    conv1d2, taps flattened
    s2_ref,        # (1, 4C)    f32
    t2_ref,        # (1, 4C)    f32
    wp_ref,        # (4C, D)    bf16    final Linear projection
    bp_ref,        # (1, D)     f32
    pad_row_ref,   # (1, D)     bf16    steady-state output row for padded frames
    out_ref,       # (1, TB, D) bf16    inputs_embeds tile
    x_pad_ref,     # scratch (PAD+TB, C)  bf16  (prefix = causal pad / carry)
    h1_pad_ref,    # scratch (PAD+TB, 2C) bf16
    *,
    TB, K,
):
    f32 = jnp.float32
    bf16 = jnp.bfloat16
    b = pl.program_id(0)
    t = pl.program_id(1)
    base = PAD - (K - 1)
    length = lens_ref[b]

    # First time block of each batch element: causal history is zero.
    @pl.when(t == 0)
    def _():
        x_pad_ref[pl.ds(0, PAD), :] = jnp.zeros((PAD, x_pad_ref.shape[1]), bf16)
        h1_pad_ref[pl.ds(0, PAD), :] = jnp.zeros((PAD, h1_pad_ref.shape[1]), bf16)

    # A tile whose entire conv receptive field lies in the padded region produces
    # the same constant row everywhere (ReLU(BN shift) propagated through conv2
    # and the projection); it is precomputed in the wrapper.  The condition is
    # monotone in t, so skipped tiles never feed a later non-skipped tile.
    tile_fully_padded = t * TB >= length + 2 * (K - 1)

    @pl.when(jnp.logical_not(tile_fully_padded))
    def _compute():
        # ---- stand-in encoder: Linear + ReLU (bf16 operands, f32 accumulate) --
        x = jnp.dot(speech_ref[0].astype(bf16), we_ref[...],
                    preferred_element_type=f32)
        x = jnp.maximum(x + be_ref[...], 0.0)

        # ---- adapter masked_fill(~mask, 0) built from the scalar length -------
        row = jax.lax.broadcasted_iota(jnp.int32, (TB, 1), 0) + t * TB
        x = jnp.where(row < length, x, 0.0)
        x_bf = x.astype(bf16)
        x_pad_ref[pl.ds(PAD, TB), :] = x_bf          # data block, tile-aligned

        # ---- Conv1d #1 (C -> 2C): K taps fused into one MXU contraction -------
        win1 = jnp.concatenate(
            [x_pad_ref[pl.ds(base + j, TB), :] for j in range(K)], axis=-1)
        h1 = jnp.dot(win1, w1_ref[...], preferred_element_type=f32)
        h1 = jnp.maximum(h1 * s1_ref[...] + t1_ref[...], 0.0)   # folded BN + ReLU
        h1_bf = h1.astype(bf16)
        h1_pad_ref[pl.ds(PAD, TB), :] = h1_bf

        # ---- Conv1d #2 (2C -> 4C) + BN + ReLU, fused -------------------------
        win2 = jnp.concatenate(
            [h1_pad_ref[pl.ds(base + j, TB), :] for j in range(K)], axis=-1)
        h2 = jnp.dot(win2, w2_ref[...], preferred_element_type=f32)
        h2 = jnp.maximum(h2 * s2_ref[...] + t2_ref[...], 0.0)

        # ---- Linear projection to LLM embedding dim ---------------------------
        y = jnp.dot(h2.astype(bf16), wp_ref[...], preferred_element_type=f32)
        out_ref[0] = (y + bp_ref[...]).astype(out_ref.dtype)

        # ---- carry last K-1 rows into the prefix for the next time block ------
        if K > 1:
            x_pad_ref[pl.ds(base, K - 1), :] = x_bf[TB - (K - 1):, :]
            h1_pad_ref[pl.ds(base, K - 1), :] = h1_bf[TB - (K - 1):, :]

    @pl.when(tile_fully_padded)
    def _skip():
        out_ref[0] = jnp.broadcast_to(
            pad_row_ref[...], (TB, out_ref.shape[-1])).astype(out_ref.dtype)


# ------------------------------- wrapper ------------------------------------ #
def _round_up(x, m):
    return ((x + m - 1) // m) * m


def _tpu_vmem_capacity_bytes():
    try:
        cap = getattr(pltpu.get_tpu_info(), "vmem_capacity_bytes", None)
        if cap:
            return int(cap)
    except Exception:
        pass
    return 64 * 1024 * 1024   # unknown device -> assume smallest (v7x-like) VMEM


def _padded_steady_row(params, K):
    """Output of a frame whose whole causal receptive field is padding.

    x == 0 there, so h1 == relu(t1) (constant), h2 and the projection follow.
    Computed with the same bf16-operand / f32-accumulate arithmetic as the kernel.
    """
    f32 = jnp.float32
    bf16 = jnp.bfloat16
    h1 = jnp.maximum(params["t1"], 0.0).astype(bf16)           # (1, 2C)
    win2 = jnp.tile(h1, (1, K))                                 # (1, K*2C)
    h2 = jnp.dot(win2, params["w2"], preferred_element_type=f32)
    h2 = jnp.maximum(h2 * params["s2"] + params["t2"], 0.0)
    y = jnp.dot(h2.astype(bf16), params["wp"],
                preferred_element_type=f32) + params["bp"]
    return y.astype(bf16)                                       # (1, D)


def audio_encoder_forward(speech, speech_lengths, params, *, time_block=None):
    """speech: (B, T, F), speech_lengths: (B,) int32."""
    B, T, F = speech.shape
    K = int(params["kernel_size"])
    C = params["we"].shape[1]
    D = params["wp"].shape[1]
    assert K - 1 <= PAD, "kernel_size too large for the pad prefix"

    # generation-aware VMEM budget and default time tile
    vmem_cap = _tpu_vmem_capacity_bytes()
    vmem_limit = max(32 * 1024 * 1024, int(vmem_cap * 0.78))
    if time_block is None:
        time_block = 512 if vmem_cap >= 100 * 1024 * 1024 else 256

    # bounded time tile; pad T up to a multiple of it (mask handles the tail)
    TB = max(8, min(_round_up(int(time_block), 8), _round_up(T, 8)))
    T_pad = _round_up(T, TB)
    if T_pad != T:
        speech = jnp.pad(speech, ((0, 0), (0, T_pad - T), (0, 0)))
    NT = T_pad // TB

    lens = speech_lengths.astype(jnp.int32)
    pad_row = _padded_steady_row(params, K)

    kernel = functools.partial(_audio_encoder_kernel, TB=TB, K=K)
    operands = (lens, speech,
                params["we"], params["be"],
                params["w1"], params["s1"], params["t1"],
                params["w2"], params["s2"], params["t2"],
                params["wp"], params["bp"], pad_row)

    def build(single_buffer_weights):
        # Weights use constant index maps (DMA'd once, VMEM resident).  With
        # single_buffer_weights they are additionally marked Buffered(1) so the
        # pipeline does not allocate a second (useless) buffer for them — the
        # fix that makes production C=512/D=4096 fit v7x's 64 MiB VMEM.
        if single_buffer_weights and hasattr(pl, "Buffered"):
            def const_spec(shape):
                return pl.BlockSpec(shape, lambda *_: (0,) * len(shape),
                                    pipeline_mode=pl.Buffered(1))
        else:
            def const_spec(shape):
                return pl.BlockSpec(shape, lambda *_: (0,) * len(shape))

        return pl.pallas_call(
            kernel,
            out_shape=jax.ShapeDtypeStruct((B, T_pad, D), jnp.bfloat16),
            grid_spec=pltpu.PrefetchScalarGridSpec(
                num_scalar_prefetch=1,                 # speech_lengths -> SMEM
                grid=(B, NT),
                in_specs=[
                    pl.BlockSpec((1, TB, F), lambda b, t, lens: (b, t, 0)),
                    const_spec(params["we"].shape),
                    const_spec(params["be"].shape),
                    const_spec(params["w1"].shape),
                    const_spec(params["s1"].shape),
                    const_spec(params["t1"].shape),
                    const_spec(params["w2"].shape),
                    const_spec(params["s2"].shape),
                    const_spec(params["t2"].shape),
                    const_spec(params["wp"].shape),
                    const_spec(params["bp"].shape),
                    const_spec(pad_row.shape),
                ],
                out_specs=pl.BlockSpec((1, TB, D), lambda b, t, lens: (b, t, 0)),
                scratch_shapes=[
                    pltpu.VMEM((PAD + TB, C), jnp.bfloat16),       # x halo carry
                    pltpu.VMEM((PAD + TB, 2 * C), jnp.bfloat16),   # h1 halo carry
                ],
            ),
            compiler_params=pltpu.CompilerParams(
                # time axis must stay sequential per batch element (halo carry);
                # batch axis is megacore-shardable.
                dimension_semantics=("parallel", "arbitrary"),
                vmem_limit_bytes=vmem_limit,
            ),
        )

    try:
        inputs_embeds = build(True)(*operands)
    except Exception:
        # Fallback if this Pallas build rejects Buffered(1) on pallas_call specs:
        # identical kernel, default (double-buffered) weight streams.
        inputs_embeds = build(False)(*operands)

    if T_pad != T:
        inputs_embeds = inputs_embeds[:, :T]

    attention_mask = jnp.arange(T)[None, :] < speech_lengths[:, None]   # (B, T)
    return {"inputs_embeds": inputs_embeds, "attention_mask": attention_mask}


# --------------------------- parameter construction ------------------------- #
def make_params(key, feat_dim, enc_out_dim, llm_embed_dim, kernel_size):
    ks = jax.random.split(key, 12)
    C, D, K = enc_out_dim, llm_embed_dim, kernel_size
    eps = 1e-3  # BatchNorm1d eps used by CNNAdapter

    def rnd(k, shape, scale=0.02):
        return (scale * jax.random.normal(k, shape)).astype(jnp.float32)

    bf16 = jnp.bfloat16

    # stand-in encoder linear
    we = rnd(ks[0], (feat_dim, C))
    be = rnd(ks[1], (1, C))

    # Conv1d #1: torch weight (2C, C, K), bias (2C,) -> fused taps (K*C, 2C)
    conv1_w = rnd(ks[2], (2 * C, C, K))
    conv1_b = rnd(ks[3], (2 * C,))
    w1 = jnp.transpose(conv1_w, (2, 1, 0)).reshape(K * C, 2 * C)
    gamma1 = 1.0 + rnd(ks[4], (2 * C,))
    beta1 = rnd(ks[5], (2 * C,))
    rm1, rv1 = jnp.zeros((2 * C,)), jnp.ones((2 * C,))
    s1 = (gamma1 / jnp.sqrt(rv1 + eps))[None, :]
    t1 = ((conv1_b - rm1) * s1[0] + beta1)[None, :]

    # Conv1d #2: torch weight (4C, 2C, K), bias (4C,) -> fused taps (K*2C, 4C)
    conv2_w = rnd(ks[6], (4 * C, 2 * C, K))
    conv2_b = rnd(ks[7], (4 * C,))
    w2 = jnp.transpose(conv2_w, (2, 1, 0)).reshape(K * 2 * C, 4 * C)
    gamma2 = 1.0 + rnd(ks[8], (4 * C,))
    beta2 = rnd(ks[9], (4 * C,))
    rm2, rv2 = jnp.zeros((4 * C,)), jnp.ones((4 * C,))
    s2 = (gamma2 / jnp.sqrt(rv2 + eps))[None, :]
    t2 = ((conv2_b - rm2) * s2[0] + beta2)[None, :]

    # final projection Linear(4C, D)
    wp = rnd(ks[10], (4 * C, D))
    bp = rnd(ks[11], (1, D))

    return {
        "kernel_size": K,
        # matmul weights in bf16 (MXU operands, half VMEM/HBM footprint)
        "we": we.astype(bf16), "w1": w1.astype(bf16),
        "w2": w2.astype(bf16), "wp": wp.astype(bf16),
        # biases / folded-BN scale & shift stay f32 (VPU adds)
        "be": be, "s1": s1, "t1": t1, "s2": s2, "t2": t2, "bp": bp,
    }


# --------------------------- pure-JAX reference ------------------------------ #
def _reference_forward(speech, speech_lengths, params):
    f32 = jnp.float32
    K = int(params["kernel_size"])
    B, T, F = speech.shape
    we = params["we"].astype(f32)
    w1 = params["w1"].astype(f32)     # (K*C, 2C)
    w2 = params["w2"].astype(f32)     # (K*2C, 4C)
    wp = params["wp"].astype(f32)

    x = jnp.maximum(jnp.einsum("btf,fc->btc", speech.astype(f32), we)
                    + params["be"], 0.0)
    mask = (jnp.arange(T)[None, :] < speech_lengths[:, None]).astype(f32)[..., None]
    x = x * mask

    def causal_conv(h, w_flat):
        hp = jnp.pad(h, ((0, 0), (K - 1, 0), (0, 0)))
        win = jnp.concatenate([hp[:, j:j + T] for j in range(K)], axis=-1)
        return jnp.einsum("btk,kd->btd", win, w_flat)

    h1 = jnp.maximum(causal_conv(x, w1) * params["s1"] + params["t1"], 0.0)
    h2 = jnp.maximum(causal_conv(h1, w2) * params["s2"] + params["t2"], 0.0)
    return jnp.einsum("btc,cd->btd", h2, wp) + params["bp"]


# ---------------------------------- main ------------------------------------ #
if __name__ == "__main__":
    # small shapes consistent with the module's forward
    B, T, F = 2, 32, 40          # batch, frames, speech feature dim
    ENC_OUT_DIM = 32             # enc_out_dim (small stand-in for 512)
    LLM_EMBED_DIM = 128          # llm_embed_dim (small stand-in for 4096)
    KERNEL_SIZE = 3

    key = jax.random.PRNGKey(0)
    k_sp, k_par = jax.random.split(key)

    speech = jax.random.normal(k_sp, (B, T, F), dtype=jnp.float32)
    # second utterance is short -> exercises in-tile masking, the carried halo,
    # and the fully-padded-tile fast path (tile [16,32) of batch element 1).
    speech_lengths = jnp.array([T, 10], dtype=jnp.int32)

    params = make_params(k_par, F, ENC_OUT_DIM, LLM_EMBED_DIM, KERNEL_SIZE)

    # time_block=16 so the demo exercises two time tiles + carry + skip logic
    out = audio_encoder_forward(speech, speech_lengths, params, time_block=16)
    jax.block_until_ready(out["inputs_embeds"])
    jax.block_until_ready(out["attention_mask"])

    assert out["inputs_embeds"].shape == (B, T, LLM_EMBED_DIM)
    assert out["inputs_embeds"].dtype == jnp.bfloat16
    assert out["attention_mask"].shape == (B, T)
    assert out["inputs_embeds"].shape[1] == out["attention_mask"].shape[1]

    # numerical sanity check vs pure-JAX reference (bf16 operands -> loose tol)
    ref = _reference_forward(speech, speech_lengths, params)
    err = float(jnp.max(jnp.abs(out["inputs_embeds"].astype(jnp.float32) - ref)))
    assert err < 2e-2, f"max abs error vs reference: {err}"

    print("KERNEL_OK")
</pallas_src>

<mosaic_0001>
module attributes {stable_mosaic.version = 11 : i64} {
  func.func @_audio_encoder_kernel(%arg0: i32, %arg1: i32, %arg2: memref<2xi32, #tpu.memory_space<smem>>, %arg3: memref<1x16x40xf32, #tpu.memory_space<vmem>>, %arg4: memref<40x32xbf16, #tpu.memory_space<vmem>>, %arg5: memref<1x32xf32, #tpu.memory_space<vmem>>, %arg6: memref<96x64xbf16, #tpu.memory_space<vmem>>, %arg7: memref<1x64xf32, #tpu.memory_space<vmem>>, %arg8: memref<1x64xf32, #tpu.memory_space<vmem>>, %arg9: memref<192x128xbf16, #tpu.memory_space<vmem>>, %arg10: memref<1x128xf32, #tpu.memory_space<vmem>>, %arg11: memref<1x128xf32, #tpu.memory_space<vmem>>, %arg12: memref<128x128xbf16, #tpu.memory_space<vmem>>, %arg13: memref<1x128xf32, #tpu.memory_space<vmem>>, %arg14: memref<1x128xbf16, #tpu.memory_space<vmem>>, %arg15: memref<1x16x128xbf16, #tpu.memory_space<vmem>>, %arg16: memref<32x32xbf16, #tpu.memory_space<vmem>>, %arg17: memref<32x64xbf16, #tpu.memory_space<vmem>>) attributes {dimension_semantics = [#tpu.dimension_semantics<parallel>, #tpu.dimension_semantics<arbitrary>], iteration_bounds = array<i64: 2, 2>, scalar_prefetch = 1 : i64, scratch_operands = 2 : i64, tpu.core_type = #tpu.core_type<tc>, window_params = [{transform_indices = @transform_0, window_bounds = array<i64: 1, 16, 40>}, {pipeline_mode = #tpu.pipeline_mode<synchronous>, transform_indices = @transform_1, window_bounds = array<i64: 40, 32>}, {pipeline_mode = #tpu.pipeline_mode<synchronous>, transform_indices = @transform_2, window_bounds = array<i64: 1, 32>}, {pipeline_mode = #tpu.pipeline_mode<synchronous>, transform_indices = @transform_3, window_bounds = array<i64: 96, 64>}, {pipeline_mode = #tpu.pipeline_mode<synchronous>, transform_indices = @transform_4, window_bounds = array<i64: 1, 64>}, {pipeline_mode = #tpu.pipeline_mode<synchronous>, transform_indices = @transform_5, window_bounds = array<i64: 1, 64>}, {pipeline_mode = #tpu.pipeline_mode<synchronous>, transform_indices = @transform_6, window_bounds = array<i64: 192, 128>}, {pipeline_mode = #tpu.pipeline_mode<synchronous>, transform_indices = @transform_7, window_bounds = array<i64: 1, 128>}, {pipeline_mode = #tpu.pipeline_mode<synchronous>, transform_indices = @transform_8, window_bounds = array<i64: 1, 128>}, {pipeline_mode = #tpu.pipeline_mode<synchronous>, transform_indices = @transform_9, window_bounds = array<i64: 128, 128>}, {pipeline_mode = #tpu.pipeline_mode<synchronous>, transform_indices = @transform_10, window_bounds = array<i64: 1, 128>}, {pipeline_mode = #tpu.pipeline_mode<synchronous>, transform_indices = @transform_11, window_bounds = array<i64: 1, 128>}, {transform_indices = @transform_12, window_bounds = array<i64: 1, 16, 128>}]} {
    %0 = arith.index_cast %arg0 : i32 to index
    %1 = memref.load %arg2[%0] : memref<2xi32, #tpu.memory_space<smem>>
    %c0_i32 = arith.constant 0 : i32
    %2 = arith.cmpi eq, %arg1, %c0_i32 : i32
    %3 = arith.extui %2 : i1 to i32
    %c0_i32_0 = arith.constant 0 : i32
    %4 = arith.cmpi ne, %3, %c0_i32_0 : i32
    scf.if %4 {
      %cst = arith.constant 0.000000e+00 : bf16
      %13 = vector.broadcast %cst : bf16 to vector<16x32xbf16>
      %c0 = arith.constant 0 : index
      %c0_3 = arith.constant 0 : index
      %14 = vector.load %arg16[%c0, %c0_3] : memref<32x32xbf16, #tpu.memory_space<vmem>>, vector<16x32xbf16>
      tpu.vector_store %arg16[%c0, %c0_3], %13 {strides = array<i32>} : memref<32x32xbf16, #tpu.memory_space<vmem>>, vector<16x32xbf16>,
      %cst_4 = arith.constant 0.000000e+00 : bf16
      %15 = vector.broadcast %cst_4 : bf16 to vector<16x64xbf16>
      %c0_5 = arith.constant 0 : index
      %c0_6 = arith.constant 0 : index
      %16 = vector.load %arg17[%c0_5, %c0_6] : memref<32x64xbf16, #tpu.memory_space<vmem>>, vector<16x64xbf16>
      tpu.vector_store %arg17[%c0_5, %c0_6], %15 {strides = array<i32>} : memref<32x64xbf16, #tpu.memory_space<vmem>>, vector<16x64xbf16>,
    } else {
    }
    %c16_i32 = arith.constant 16 : i32
    %5 = arith.muli %arg1, %c16_i32 : i32
    %c4_i32 = arith.constant 4 : i32
    %6 = arith.addi %1, %c4_i32 : i32
    %7 = arith.cmpi sge, %5, %6 : i32
    %true = arith.constant true
    %8 = arith.xori %7, %true : i1
    %9 = arith.extui %8 : i1 to i32
    %c0_i32_1 = arith.constant 0 : i32
    %10 = arith.cmpi ne, %9, %c0_i32_1 : i32
    scf.if %10 {
      %c0 = arith.constant 0 : index
      %c0_3 = arith.constant 0 : index
      %c0_4 = arith.constant 0 : index
      %13 = vector.load %arg3[%c0, %c0_3, %c0_4] : memref<1x16x40xf32, #tpu.memory_space<vmem>>, vector<1x16x40xf32>
      %14 = vector.shape_cast %13 : vector<1x16x40xf32> to vector<16x40xf32>
      %15 = arith.truncf %14 : vector<16x40xf32> to vector<16x40xbf16>
      %c0_5 = arith.constant 0 : index
      %c0_6 = arith.constant 0 : index
      %16 = vector.load %arg4[%c0_5, %c0_6] : memref<40x32xbf16, #tpu.memory_space<vmem>>, vector<40x32xbf16>
      %cst = arith.constant dense<0.000000e+00> : vector<16x32xf32>
      %17 = tpu.matmul %15, %16, %cst {dimension_numbers = #tpu.dot_dimension_numbers<[1], [0], [0], [1], [0, 0, 1, 1], [], []>} : vector<16x40xbf16>, vector<40x32xbf16>, vector<16x32xf32> -> vector<16x32xf32>
      %c0_7 = arith.constant 0 : index
      %c0_8 = arith.constant 0 : index
      %18 = vector.load %arg5[%c0_7, %c0_8] : memref<1x32xf32, #tpu.memory_space<vmem>>, vector<1x32xf32>
      %19 = vector.broadcast %18 : vector<1x32xf32> to vector<16x32xf32>
      %20 = arith.addf %17, %19 : vector<16x32xf32>
      %cst_9 = arith.constant 0.000000e+00 : f32
      %21 = vector.broadcast %cst_9 : f32 to vector<16x32xf32>
      %22 = arith.maximumf %20, %21 : vector<16x32xf32>
      %23 = tpu.iota {dimensions = array<i32: 0>} : vector<16x1xi32>
      %c16_i32_10 = arith.constant 16 : i32
      %24 = arith.muli %arg1, %c16_i32_10 : i32
      %25 = vector.broadcast %24 : i32 to vector<16x1xi32>
      %26 = arith.addi %23, %25 : vector<16x1xi32>
      %27 = vector.broadcast %1 : i32 to vector<16x1xi32>
      %28 = arith.cmpi slt, %26, %27 : vector<16x1xi32>
      %cst_11 = arith.constant 0.000000e+00 : f32
      %29 = vector.shape_cast %28 : vector<16x1xi1> to vector<16x1xi1>
      %30 = vector.broadcast %29 : vector<16x1xi1> to vector<16x32xi1>
      %31 = vector.broadcast %cst_11 : f32 to vector<16x32xf32>
      %32 = arith.select %30, %22, %31 : vector<16x32xi1>, vector<16x32xf32>
      %33 = arith.truncf %32 : vector<16x32xf32> to vector<16x32xbf16>
      %c16 = arith.constant 16 : index
      %c0_12 = arith.constant 0 : index
      %34 = vector.load %arg16[%c16, %c0_12] : memref<32x32xbf16, #tpu.memory_space<vmem>>, vector<16x32xbf16>
      tpu.vector_store %arg16[%c16, %c0_12], %33 {strides = array<i32>} : memref<32x32xbf16, #tpu.memory_space<vmem>>, vector<16x32xbf16>,
      %c14 = arith.constant 14 : index
      %c0_13 = arith.constant 0 : index
      %35 = vector.load %arg16[%c14, %c0_13] : memref<32x32xbf16, #tpu.memory_space<vmem>>, vector<16x32xbf16>
      %c15 = arith.constant 15 : index
      %c0_14 = arith.constant 0 : index
      %36 = vector.load %arg16[%c15, %c0_14] : memref<32x32xbf16, #tpu.memory_space<vmem>>, vector<16x32xbf16>
      %c16_15 = arith.constant 16 : index
      %c0_16 = arith.constant 0 : index
      %37 = vector.load %arg16[%c16_15, %c0_16] : memref<32x32xbf16, #tpu.memory_space<vmem>>, vector<16x32xbf16>
      %38 = tpu.concatenate %35, %36, %37 in 1 : vector<16x32xbf16>, vector<16x32xbf16>, vector<16x32xbf16> -> vector<16x96xbf16>
      %c0_17 = arith.constant 0 : index
      %c0_18 = arith.constant 0 : index
      %39 = vector.load %arg6[%c0_17, %c0_18] : memref<96x64xbf16, #tpu.memory_space<vmem>>, vector<96x64xbf16>
      %cst_19 = arith.constant dense<0.000000e+00> : vector<16x64xf32>
      %40 = tpu.matmul %38, %39, %cst_19 {dimension_numbers = #tpu.dot_dimension_numbers<[1], [0], [0], [1], [0, 0, 1, 1], [], []>} : vector<16x96xbf16>, vector<96x64xbf16>, vector<16x64xf32> -> vector<16x64xf32>
      %c0_20 = arith.constant 0 : index
      %c0_21 = arith.constant 0 : index
      %41 = vector.load %arg7[%c0_20, %c0_21] : memref<1x64xf32, #tpu.memory_space<vmem>>, vector<1x64xf32>
      %42 = vector.broadcast %41 : vector<1x64xf32> to vector<16x64xf32>
      %43 = arith.mulf %40, %42 : vector<16x64xf32>
      %c0_22 = arith.constant 0 : index
      %c0_23 = arith.constant 0 : index
      %44 = vector.load %arg8[%c0_22, %c0_23] : memref<1x64xf32, #tpu.memory_space<vmem>>, vector<1x64xf32>
      %45 = vector.broadcast %44 : vector<1x64xf32> to vector<16x64xf32>
      %46 = arith.addf %43, %45 : vector<16x64xf32>
      %cst_24 = arith.constant 0.000000e+00 : f32
      %47 = vector.broadcast %cst_24 : f32 to vector<16x64xf32>
      %48 = arith.maximumf %46, %47 : vector<16x64xf32>
      %49 = arith.truncf %48 : vector<16x64xf32> to vector<16x64xbf16>
      %c16_25 = arith.constant 16 : index
      %c0_26 = arith.constant 0 : index
      %50 = vector.load %arg17[%c16_25, %c0_26] : memref<32x64xbf16, #tpu.memory_space<vmem>>, vector<16x64xbf16>
      tpu.vector_store %arg17[%c16_25, %c0_26], %49 {strides = array<i32>} : memref<32x64xbf16, #tpu.memory_space<vmem>>, vector<16x64xbf16>,
      %c14_27 = arith.constant 14 : index
      %c0_28 = arith.constant 0 : index
      %51 = vector.load %arg17[%c14_27, %c0_28] : memref<32x64xbf16, #tpu.memory_space<vmem>>, vector<16x64xbf16>
      %c15_29 = arith.constant 15 : index
      %c0_30 = arith.constant 0 : index
      %52 = vector.load %arg17[%c15_29, %c0_30] : memref<32x64xbf16, #tpu.memory_space<vmem>>, vector<16x64xbf16>
      %c16_31 = arith.constant 16 : index
      %c0_32 = arith.constant 0 : index
      %53 = vector.load %arg17[%c16_31, %c0_32] : memref<32x64xbf16, #tpu.memory_space<vmem>>, vector<16x64xbf16>
      %54 = tpu.concatenate %51, %52, %53 in 1 : vector<16x64xbf16>, vector<16x64xbf16>, vector<16x64xbf16> -> vector<16x192xbf16>
      %c0_33 = arith.constant 0 : index
      %c0_34 = arith.constant 0 : index
      %55 = vector.load %arg9[%c0_33, %c0_34] : memref<192x128xbf16, #tpu.memory_space<vmem>>, vector<192x128xbf16>
      %cst_35 = arith.constant dense<0.000000e+00> : vector<16x128xf32>
      %56 = tpu.matmul %54, %55, %cst_35 {dimension_numbers = #tpu.dot_dimension_numbers<[1], [0], [0], [1], [0, 0, 1, 1], [], []>} : vector<16x192xbf16>, vector<192x128xbf16>, vector<16x128xf32> -> vector<16x128xf32>
      %c0_36 = arith.constant 0 : index
      %c0_37 = arith.constant 0 : index
      %57 = vector.load %arg10[%c0_36, %c0_37] : memref<1x128xf32, #tpu.memory_space<vmem>>, vector<1x128xf32>
      %58 = vector.broadcast %57 : vector<1x128xf32> to vector<16x128xf32>
      %59 = arith.mulf %56, %58 : vector<16x128xf32>
      %c0_38 = arith.constant 0 : index
      %c0_39 = arith.constant 0 : index
      %60 = vector.load %arg11[%c0_38, %c0_39] : memref<1x128xf32, #tpu.memory_space<vmem>>, vector<1x128xf32>
      %61 = vector.broadcast %60 : vector<1x128xf32> to vector<16x128xf32>
      %62 = arith.addf %59, %61 : vector<16x128xf32>
      %cst_40 = arith.constant 0.000000e+00 : f32
      %63 = vector.broadcast %cst_40 : f32 to vector<16x128xf32>
      %64 = arith.maximumf %62, %63 : vector<16x128xf32>
      %65 = arith.truncf %64 : vector<16x128xf32> to vector<16x128xbf16>
      %c0_41 = arith.constant 0 : index
      %c0_42 = arith.constant 0 : index
      %66 = vector.load %arg12[%c0_41, %c0_42] : memref<128x128xbf16, #tpu.memory_space<vmem>>, vector<128x128xbf16>
      %cst_43 = arith.constant dense<0.000000e+00> : vector<16x128xf32>
      %67 = tpu.matmul %65, %66, %cst_43 {dimension_numbers = #tpu.dot_dimension_numbers<[1], [0], [0], [1], [0, 0, 1, 1], [], []>} : vector<16x128xbf16>, vector<128x128xbf16>, vector<16x128xf32> -> vector<16x128xf32>
      %c0_44 = arith.constant 0 : index
      %c0_45 = arith.constant 0 : index
      %68 = vector.load %arg13[%c0_44, %c0_45] : memref<1x128xf32, #tpu.memory_space<vmem>>, vector<1x128xf32>
      %69 = vector.broadcast %68 : vector<1x128xf32> to vector<16x128xf32>
      %70 = arith.addf %67, %69 : vector<16x128xf32>
      %71 = arith.truncf %70 : vector<16x128xf32> to vector<16x128xbf16>
      %c0_46 = arith.constant 0 : index
      %c0_47 = arith.constant 0 : index
      %c0_48 = arith.constant 0 : index
      %72 = vector.load %arg15[%c0_46, %c0_47, %c0_48] : memref<1x16x128xbf16, #tpu.memory_space<vmem>>, vector<1x16x128xbf16>
      %73 = vector.shape_cast %72 : vector<1x16x128xbf16> to vector<16x128xbf16>
      %74 = vector.shape_cast %71 : vector<16x128xbf16> to vector<1x16x128xbf16>
      tpu.vector_store %arg15[%c0_46, %c0_47, %c0_48], %74 {strides = array<i32>} : memref<1x16x128xbf16, #tpu.memory_space<vmem>>, vector<1x16x128xbf16>,
      %75 = vector.extract_strided_slice %33 {offsets = [14, 0], sizes = [2, 32], strides = [1, 1]} : vector<16x32xbf16> to vector<2x32xbf16>
      %c14_49 = arith.constant 14 : index
      %c0_50 = arith.constant 0 : index
      %76 = vector.load %arg16[%c14_49, %c0_50] : memref<32x32xbf16, #tpu.memory_space<vmem>>, vector<2x32xbf16>
      tpu.vector_store %arg16[%c14_49, %c0_50], %75 {strides = array<i32>} : memref<32x32xbf16, #tpu.memory_space<vmem>>, vector<2x32xbf16>,
      %77 = vector.extract_strided_slice %49 {offsets = [14, 0], sizes = [2, 64], strides = [1, 1]} : vector<16x64xbf16> to vector<2x64xbf16>
      %c14_51 = arith.constant 14 : index
      %c0_52 = arith.constant 0 : index
      %78 = vector.load %arg17[%c14_51, %c0_52] : memref<32x64xbf16, #tpu.memory_space<vmem>>, vector<2x64xbf16>
      tpu.vector_store %arg17[%c14_51, %c0_52], %77 {strides = array<i32>} : memref<32x64xbf16, #tpu.memory_space<vmem>>, vector<2x64xbf16>,
    } else {
    }
    %11 = arith.extui %7 : i1 to i32
    %c0_i32_2 = arith.constant 0 : i32
    %12 = arith.cmpi ne, %11, %c0_i32_2 : i32
    scf.if %12 {
      %c0 = arith.constant 0 : index
      %c0_3 = arith.constant 0 : index
      %13 = vector.load %arg14[%c0, %c0_3] : memref<1x128xbf16, #tpu.memory_space<vmem>>, vector<1x128xbf16>
      %14 = vector.shape_cast %13 : vector<1x128xbf16> to vector<1x128xbf16>
      %15 = vector.broadcast %14 : vector<1x128xbf16> to vector<16x128xbf16>
      %c0_4 = arith.constant 0 : index
      %c0_5 = arith.constant 0 : index
      %c0_6 = arith.constant 0 : index
      %16 = vector.load %arg15[%c0_4, %c0_5, %c0_6] : memref<1x16x128xbf16, #tpu.memory_space<vmem>>, vector<1x16x128xbf16>
      %17 = vector.shape_cast %16 : vector<1x16x128xbf16> to vector<16x128xbf16>
      %18 = vector.shape_cast %15 : vector<16x128xbf16> to vector<1x16x128xbf16>
      tpu.vector_store %arg15[%c0_4, %c0_5, %c0_6], %18 {strides = array<i32>} : memref<1x16x128xbf16, #tpu.memory_space<vmem>>, vector<1x16x128xbf16>,
    } else {
    }
    return
  }
  func.func @transform_0(%arg0: i32, %arg1: i32, %arg2: memref<2xi32, #tpu.memory_space<smem>>) -> (i32, i32, i32) {
    %c0_i32 = arith.constant 0 : i32
    %c0_i32_0 = arith.constant 0 : i32
    return %arg0, %arg1, %c0_i32 : i32, i32, i32
  }
  func.func @transform_1(%arg0: i32, %arg1: i32, %arg2: memref<2xi32, #tpu.memory_space<smem>>) -> (i32, i32) {
    %c0_i32 = arith.constant 0 : i32
    %c0_i32_0 = arith.constant 0 : i32
    %c0_i32_1 = arith.constant 0 : i32
    return %c0_i32, %c0_i32_0 : i32, i32
  }
  func.func @transform_2(%arg0: i32, %arg1: i32, %arg2: memref<2xi32, #tpu.memory_space<smem>>) -> (i32, i32) {
    %c0_i32 = arith.constant 0 : i32
    %c0_i32_0 = arith.constant 0 : i32
    %c0_i32_1 = arith.constant 0 : i32
    return %c0_i32, %c0_i32_0 : i32, i32
  }
  func.func @transform_3(%arg0: i32, %arg1: i32, %arg2: memref<2xi32, #tpu.memory_space<smem>>) -> (i32, i32) {
    %c0_i32 = arith.constant 0 : i32
    %c0_i32_0 = arith.constant 0 : i32
    %c0_i32_1 = arith.constant 0 : i32
    return %c0_i32, %c0_i32_0 : i32, i32
  }
  func.func @transform_4(%arg0: i32, %arg1: i32, %arg2: memref<2xi32, #tpu.memory_space<smem>>) -> (i32, i32) {
    %c0_i32 = arith.constant 0 : i32
    %c0_i32_0 = arith.constant 0 : i32
    %c0_i32_1 = arith.constant 0 : i32
    return %c0_i32, %c0_i32_0 : i32, i32
  }
  func.func @transform_5(%arg0: i32, %arg1: i32, %arg2: memref<2xi32, #tpu.memory_space<smem>>) -> (i32, i32) {
    %c0_i32 = arith.constant 0 : i32
    %c0_i32_0 = arith.constant 0 : i32
    %c0_i32_1 = arith.constant 0 : i32
    return %c0_i32, %c0_i32_0 : i32, i32
  }
  func.func @transform_6(%arg0: i32, %arg1: i32, %arg2: memref<2xi32, #tpu.memory_space<smem>>) -> (i32, i32) {
    %c0_i32 = arith.constant 0 : i32
    %c0_i32_0 = arith.constant 0 : i32
    %c0_i32_1 = arith.constant 0 : i32
    return %c0_i32, %c0_i32_0 : i32, i32
  }
  func.func @transform_7(%arg0: i32, %arg1: i32, %arg2: memref<2xi32, #tpu.memory_space<smem>>) -> (i32, i32) {
    %c0_i32 = arith.constant 0 : i32
    %c0_i32_0 = arith.constant 0 : i32
    %c0_i32_1 = arith.constant 0 : i32
    return %c0_i32, %c0_i32_0 : i32, i32
  }
  func.func @transform_8(%arg0: i32, %arg1: i32, %arg2: memref<2xi32, #tpu.memory_space<smem>>) -> (i32, i32) {
    %c0_i32 = arith.constant 0 : i32
    %c0_i32_0 = arith.constant 0 : i32
    %c0_i32_1 = arith.constant 0 : i32
    return %c0_i32, %c0_i32_0 : i32, i32
  }
  func.func @transform_9(%arg0: i32, %arg1: i32, %arg2: memref<2xi32, #tpu.memory_space<smem>>) -> (i32, i32) {
    %c0_i32 = arith.constant 0 : i32
    %c0_i32_0 = arith.constant 0 : i32
    %c0_i32_1 = arith.constant 0 : i32
    return %c0_i32, %c0_i32_0 : i32, i32
  }
  func.func @transform_10(%arg0: i32, %arg1: i32, %arg2: memref<2xi32, #tpu.memory_space<smem>>) -> (i32, i32) {
    %c0_i32 = arith.constant 0 : i32
    %c0_i32_0 = arith.constant 0 : i32
    %c0_i32_1 = arith.constant 0 : i32
    return %c0_i32, %c0_i32_0 : i32, i32
  }
  func.func @transform_11(%arg0: i32, %arg1: i32, %arg2: memref<2xi32, #tpu.memory_space<smem>>) -> (i32, i32) {
    %c0_i32 = arith.constant 0 : i32
    %c0_i32_0 = arith.constant 0 : i32
    %c0_i32_1 = arith.constant 0 : i32
    return %c0_i32, %c0_i32_0 : i32, i32
  }
  func.func @transform_12(%arg0: i32, %arg1: i32, %arg2: memref<2xi32, #tpu.memory_space<smem>>) -> (i32, i32, i32) {
    %c0_i32 = arith.constant 0 : i32
    %c0_i32_0 = arith.constant 0 : i32
    return %arg0, %arg1, %c0_i32 : i32, i32, i32
  }
}

module attributes {stable_mosaic.version = 11 : i64} {
  func.func @_audio_encoder_kernel(%arg0: i32, %arg1: i32, %arg2: memref<2xi32, #tpu.memory_space<smem>>, %arg3: memref<1x16x40xf32, #tpu.memory_space<vmem>>, %arg4: memref<40x32xbf16, #tpu.memory_space<vmem>>, %arg5: memref<1x32xf32, #tpu.memory_space<vmem>>, %arg6: memref<96x64xbf16, #tpu.memory_space<vmem>>, %arg7: memref<1x64xf32, #tpu.memory_space<vmem>>, %arg8: memref<1x64xf32, #tpu.memory_space<vmem>>, %arg9: memref<192x128xbf16, #tpu.memory_space<vmem>>, %arg10: memref<1x128xf32, #tpu.memory_space<vmem>>, %arg11: memref<1x128xf32, #tpu.memory_space<vmem>>, %arg12: memref<128x128xbf16, #tpu.memory_space<vmem>>, %arg13: memref<1x128xf32, #tpu.memory_space<vmem>>, %arg14: memref<1x128xbf16, #tpu.memory_space<vmem>>, %arg15: memref<1x16x128xbf16, #tpu.memory_space<vmem>>, %arg16: memref<32x32xbf16, #tpu.memory_space<vmem>>, %arg17: memref<32x64xbf16, #tpu.memory_space<vmem>>) attributes {dimension_semantics = [#tpu.dimension_semantics<parallel>, #tpu.dimension_semantics<arbitrary>], iteration_bounds = array<i64: 2, 2>, scalar_prefetch = 1 : i64, scratch_operands = 2 : i64, tpu.core_type = #tpu.core_type<tc>, window_params = [{transform_indices = @transform_0, window_bounds = array<i64: 1, 16, 40>}, {pipeline_mode = #tpu.pipeline_mode<synchronous>, transform_indices = @transform_1, window_bounds = array<i64: 40, 32>}, {pipeline_mode = #tpu.pipeline_mode<synchronous>, transform_indices = @transform_2, window_bounds = array<i64: 1, 32>}, {pipeline_mode = #tpu.pipeline_mode<synchronous>, transform_indices = @transform_3, window_bounds = array<i64: 96, 64>}, {pipeline_mode = #tpu.pipeline_mode<synchronous>, transform_indices = @transform_4, window_bounds = array<i64: 1, 64>}, {pipeline_mode = #tpu.pipeline_mode<synchronous>, transform_indices = @transform_5, window_bounds = array<i64: 1, 64>}, {pipeline_mode = #tpu.pipeline_mode<synchronous>, transform_indices = @transform_6, window_bounds = array<i64: 192, 128>}, {pipeline_mode = #tpu.pipeline_mode<synchronous>, transform_indices = @transform_7, window_bounds = array<i64: 1, 128>}, {pipeline_mode = #tpu.pipeline_mode<synchronous>, transform_indices = @transform_8, window_bounds = array<i64: 1, 128>}, {pipeline_mode = #tpu.pipeline_mode<synchronous>, transform_indices = @transform_9, window_bounds = array<i64: 128, 128>}, {pipeline_mode = #tpu.pipeline_mode<synchronous>, transform_indices = @transform_10, window_bounds = array<i64: 1, 128>}, {pipeline_mode = #tpu.pipeline_mode<synchronous>, transform_indices = @transform_11, window_bounds = array<i64: 1, 128>}, {transform_indices = @transform_12, window_bounds = array<i64: 1, 16, 128>}]} {
    %0 = arith.index_cast %arg0 : i32 to index
    %1 = memref.load %arg2[%0] : memref<2xi32, #tpu.memory_space<smem>>
    %c0_i32 = arith.constant 0 : i32
    %2 = arith.cmpi eq, %arg1, %c0_i32 : i32
    %3 = arith.extui %2 : i1 to i32
    %c0_i32_0 = arith.constant 0 : i32
    %4 = arith.cmpi ne, %3, %c0_i32_0 : i32
    scf.if %4 {
      %cst = arith.constant 0.000000e+00 : bf16
      %13 = vector.broadcast %cst : bf16 to vector<16x32xbf16>
      %c0 = arith.constant 0 : index
      %c0_3 = arith.constant 0 : index
      %14 = vector.load %arg16[%c0, %c0_3] : memref<32x32xbf16, #tpu.memory_space<vmem>>, vector<16x32xbf16>
      tpu.vector_store %arg16[%c0, %c0_3], %13 {strides = array<i32>} : memref<32x32xbf16, #tpu.memory_space<vmem>>, vector<16x32xbf16>,
      %cst_4 = arith.constant 0.000000e+00 : bf16
      %15 = vector.broadcast %cst_4 : bf16 to vector<16x64xbf16>
      %c0_5 = arith.constant 0 : index
      %c0_6 = arith.constant 0 : index
      %16 = vector.load %arg17[%c0_5, %c0_6] : memref<32x64xbf16, #tpu.memory_space<vmem>>, vector<16x64xbf16>
      tpu.vector_store %arg17[%c0_5, %c0_6], %15 {strides = array<i32>} : memref<32x64xbf16, #tpu.memory_space<vmem>>, vector<16x64xbf16>,
    } else {
    }
    %c16_i32 = arith.constant 16 : i32
    %5 = arith.muli %arg1, %c16_i32 : i32
    %c4_i32 = arith.constant 4 : i32
    %6 = arith.addi %1, %c4_i32 : i32
    %7 = arith.cmpi sge, %5, %6 : i32
    %true = arith.constant true
    %8 = arith.xori %7, %true : i1
    %9 = arith.extui %8 : i1 to i32
    %c0_i32_1 = arith.constant 0 : i32
    %10 = arith.cmpi ne, %9, %c0_i32_1 : i32
    scf.if %10 {
      %c0 = arith.constant 0 : index
      %c0_3 = arith.constant 0 : index
      %c0_4 = arith.constant 0 : index
      %13 = vector.load %arg3[%c0, %c0_3, %c0_4] : memref<1x16x40xf32, #tpu.memory_space<vmem>>, vector<1x16x40xf32>
      %14 = vector.shape_cast %13 : vector<1x16x40xf32> to vector<16x40xf32>
      %15 = arith.truncf %14 : vector<16x40xf32> to vector<16x40xbf16>
      %c0_5 = arith.constant 0 : index
      %c0_6 = arith.constant 0 : index
      %16 = vector.load %arg4[%c0_5, %c0_6] : memref<40x32xbf16, #tpu.memory_space<vmem>>, vector<40x32xbf16>
      %cst = arith.constant dense<0.000000e+00> : vector<16x32xf32>
      %17 = tpu.matmul %15, %16, %cst {dimension_numbers = #tpu.dot_dimension_numbers<[1], [0], [0], [1], [0, 0, 1, 1], [], []>} : vector<16x40xbf16>, vector<40x32xbf16>, vector<16x32xf32> -> vector<16x32xf32>
      %c0_7 = arith.constant 0 : index
      %c0_8 = arith.constant 0 : index
      %18 = vector.load %arg5[%c0_7, %c0_8] : memref<1x32xf32, #tpu.memory_space<vmem>>, vector<1x32xf32>
      %19 = vector.broadcast %18 : vector<1x32xf32> to vector<16x32xf32>
      %20 = arith.addf %17, %19 : vector<16x32xf32>
      %cst_9 = arith.constant 0.000000e+00 : f32
      %21 = vector.broadcast %cst_9 : f32 to vector<16x32xf32>
      %22 = arith.maximumf %20, %21 : vector<16x32xf32>
      %23 = tpu.iota {dimensions = array<i32: 0>} : vector<16x1xi32>
      %c16_i32_10 = arith.constant 16 : i32
      %24 = arith.muli %arg1, %c16_i32_10 : i32
      %25 = vector.broadcast %24 : i32 to vector<16x1xi32>
      %26 = arith.addi %23, %25 : vector<16x1xi32>
      %27 = vector.broadcast %1 : i32 to vector<16x1xi32>
      %28 = arith.cmpi slt, %26, %27 : vector<16x1xi32>
      %cst_11 = arith.constant 0.000000e+00 : f32
      %29 = vector.shape_cast %28 : vector<16x1xi1> to vector<16x1xi1>
      %30 = vector.broadcast %29 : vector<16x1xi1> to vector<16x32xi1>
      %31 = vector.broadcast %cst_11 : f32 to vector<16x32xf32>
      %32 = arith.select %30, %22, %31 : vector<16x32xi1>, vector<16x32xf32>
      %33 = arith.truncf %32 : vector<16x32xf32> to vector<16x32xbf16>
      %c16 = arith.constant 16 : index
      %c0_12 = arith.constant 0 : index
      %34 = vector.load %arg16[%c16, %c0_12] : memref<32x32xbf16, #tpu.memory_space<vmem>>, vector<16x32xbf16>
      tpu.vector_store %arg16[%c16, %c0_12], %33 {strides = array<i32>} : memref<32x32xbf16, #tpu.memory_space<vmem>>, vector<16x32xbf16>,
      %c14 = arith.constant 14 : index
      %c0_13 = arith.constant 0 : index
      %35 = vector.load %arg16[%c14, %c0_13] : memref<32x32xbf16, #tpu.memory_space<vmem>>, vector<16x32xbf16>
      %c15 = arith.constant 15 : index
      %c0_14 = arith.constant 0 : index
      %36 = vector.load %arg16[%c15, %c0_14] : memref<32x32xbf16, #tpu.memory_space<vmem>>, vector<16x32xbf16>
      %c16_15 = arith.constant 16 : index
      %c0_16 = arith.constant 0 : index
      %37 = vector.load %arg16[%c16_15, %c0_16] : memref<32x32xbf16, #tpu.memory_space<vmem>>, vector<16x32xbf16>
      %38 = tpu.concatenate %35, %36, %37 in 1 : vector<16x32xbf16>, vector<16x32xbf16>, vector<16x32xbf16> -> vector<16x96xbf16>
      %c0_17 = arith.constant 0 : index
      %c0_18 = arith.constant 0 : index
      %39 = vector.load %arg6[%c0_17, %c0_18] : memref<96x64xbf16, #tpu.memory_space<vmem>>, vector<96x64xbf16>
      %cst_19 = arith.constant dense<0.000000e+00> : vector<16x64xf32>
      %40 = tpu.matmul %38, %39, %cst_19 {dimension_numbers = #tpu.dot_dimension_numbers<[1], [0], [0], [1], [0, 0, 1, 1], [], []>} : vector<16x96xbf16>, vector<96x64xbf16>, vector<16x64xf32> -> vector<16x64xf32>
      %c0_20 = arith.constant 0 : index
      %c0_21 = arith.constant 0 : index
      %41 = vector.load %arg7[%c0_20, %c0_21] : memref<1x64xf32, #tpu.memory_space<vmem>>, vector<1x64xf32>
      %42 = vector.broadcast %41 : vector<1x64xf32> to vector<16x64xf32>
      %43 = arith.mulf %40, %42 : vector<16x64xf32>
      %c0_22 = arith.constant 0 : index
      %c0_23 = arith.constant 0 : index
      %44 = vector.load %arg8[%c0_22, %c0_23] : memref<1x64xf32, #tpu.memory_space<vmem>>, vector<1x64xf32>
      %45 = vector.broadcast %44 : vector<1x64xf32> to vector<16x64xf32>
      %46 = arith.addf %43, %45 : vector<16x64xf32>
      %cst_24 = arith.constant 0.000000e+00 : f32
      %47 = vector.broadcast %cst_24 : f32 to vector<16x64xf32>
      %48 = arith.maximumf %46, %47 : vector<16x64xf32>
      %49 = arith.truncf %48 : vector<16x64xf32> to vector<16x64xbf16>
      %c16_25 = arith.constant 16 : index
      %c0_26 = arith.constant 0 : index
      %50 = vector.load %arg17[%c16_25, %c0_26] : memref<32x64xbf16, #tpu.memory_space<vmem>>, vector<16x64xbf16>
      tpu.vector_store %arg17[%c16_25, %c0_26], %49 {strides = array<i32>} : memref<32x64xbf16, #tpu.memory_space<vmem>>, vector<16x64xbf16>,
      %c14_27 = arith.constant 14 : index
      %c0_28 = arith.constant 0 : index
      %51 = vector.load %arg17[%c14_27, %c0_28] : memref<32x64xbf16, #tpu.memory_space<vmem>>, vector<16x64xbf16>
      %c15_29 = arith.constant 15 : index
      %c0_30 = arith.constant 0 : index
      %52 = vector.load %arg17[%c15_29, %c0_30] : memref<32x64xbf16, #tpu.memory_space<vmem>>, vector<16x64xbf16>
      %c16_31 = arith.constant 16 : index
      %c0_32 = arith.constant 0 : index
      %53 = vector.load %arg17[%c16_31, %c0_32] : memref<32x64xbf16, #tpu.memory_space<vmem>>, vector<16x64xbf16>
      %54 = tpu.concatenate %51, %52, %53 in 1 : vector<16x64xbf16>, vector<16x64xbf16>, vector<16x64xbf16> -> vector<16x192xbf16>
      %c0_33 = arith.constant 0 : index
      %c0_34 = arith.constant 0 : index
      %55 = vector.load %arg9[%c0_33, %c0_34] : memref<192x128xbf16, #tpu.memory_space<vmem>>, vector<192x128xbf16>
      %cst_35 = arith.constant dense<0.000000e+00> : vector<16x128xf32>
      %56 = tpu.matmul %54, %55, %cst_35 {dimension_numbers = #tpu.dot_dimension_numbers<[1], [0], [0], [1], [0, 0, 1, 1], [], []>} : vector<16x192xbf16>, vector<192x128xbf16>, vector<16x128xf32> -> vector<16x128xf32>
      %c0_36 = arith.constant 0 : index
      %c0_37 = arith.constant 0 : index
      %57 = vector.load %arg10[%c0_36, %c0_37] : memref<1x128xf32, #tpu.memory_space<vmem>>, vector<1x128xf32>
      %58 = vector.broadcast %57 : vector<1x128xf32> to vector<16x128xf32>
      %59 = arith.mulf %56, %58 : vector<16x128xf32>
      %c0_38 = arith.constant 0 : index
      %c0_39 = arith.constant 0 : index
      %60 = vector.load %arg11[%c0_38, %c0_39] : memref<1x128xf32, #tpu.memory_space<vmem>>, vector<1x128xf32>
      %61 = vector.broadcast %60 : vector<1x128xf32> to vector<16x128xf32>
      %62 = arith.addf %59, %61 : vector<16x128xf32>
      %cst_40 = arith.constant 0.000000e+00 : f32
      %63 = vector.broadcast %cst_40 : f32 to vector<16x128xf32>
      %64 = arith.maximumf %62, %63 : vector<16x128xf32>
      %65 = arith.truncf %64 : vector<16x128xf32> to vector<16x128xbf16>
      %c0_41 = arith.constant 0 : index
      %c0_42 = arith.constant 0 : index
      %66 = vector.load %arg12[%c0_41, %c0_42] : memref<128x128xbf16, #tpu.memory_space<vmem>>, vector<128x128xbf16>
      %cst_43 = arith.constant dense<0.000000e+00> : vector<16x128xf32>
      %67 = tpu.matmul %65, %66, %cst_43 {dimension_numbers = #tpu.dot_dimension_numbers<[1], [0], [0], [1], [0, 0, 1, 1], [], []>} : vector<16x128xbf16>, vector<128x128xbf16>, vector<16x128xf32> -> vector<16x128xf32>
      %c0_44 = arith.constant 0 : index
      %c0_45 = arith.constant 0 : index
      %68 = vector.load %arg13[%c0_44, %c0_45] : memref<1x128xf32, #tpu.memory_space<vmem>>, vector<1x128xf32>
      %69 = vector.broadcast %68 : vector<1x128xf32> to vector<16x128xf32>
      %70 = arith.addf %67, %69 : vector<16x128xf32>
      %71 = arith.truncf %70 : vector<16x128xf32> to vector<16x128xbf16>
      %c0_46 = arith.constant 0 : index
      %c0_47 = arith.constant 0 : index
      %c0_48 = arith.constant 0 : index
      %72 = vector.load %arg15[%c0_46, %c0_47, %c0_48] : memref<1x16x128xbf16, #tpu.memory_space<vmem>>, vector<1x16x128xbf16>
      %73 = vector.shape_cast %72 : vector<1x16x128xbf16> to vector<16x128xbf16>
      %74 = vector.shape_cast %71 : vector<16x128xbf16> to vector<1x16x128xbf16>
      tpu.vector_store %arg15[%c0_46, %c0_47, %c0_48], %74 {strides = array<i32>} : memref<1x16x128xbf16, #tpu.memory_space<vmem>>, vector<1x16x128xbf16>,
      %75 = vector.extract_strided_slice %33 {offsets = [14, 0], sizes = [2, 32], strides = [1, 1]} : vector<16x32xbf16> to vector<2x32xbf16>
      %c14_49 = arith.constant 14 : index
      %c0_50 = arith.constant 0 : index
      %76 = vector.load %arg16[%c14_49, %c0_50] : memref<32x32xbf16, #tpu.memory_space<vmem>>, vector<2x32xbf16>
      tpu.vector_store %arg16[%c14_49, %c0_50], %75 {strides = array<i32>} : memref<32x32xbf16, #tpu.memory_space<vmem>>, vector<2x32xbf16>,
      %77 = vector.extract_strided_slice %49 {offsets = [14, 0], sizes = [2, 64], strides = [1, 1]} : vector<16x64xbf16> to vector<2x64xbf16>
      %c14_51 = arith.constant 14 : index
      %c0_52 = arith.constant 0 : index
      %78 = vector.load %arg17[%c14_51, %c0_52] : memref<32x64xbf16, #tpu.memory_space<vmem>>, vector<2x64xbf16>
      tpu.vector_store %arg17[%c14_51, %c0_52], %77 {strides = array<i32>} : memref<32x64xbf16, #tpu.memory_space<vmem>>, vector<2x64xbf16>,
    } else {
    }
    %11 = arith.extui %7 : i1 to i32
    %c0_i32_2 = arith.constant 0 : i32
    %12 = arith.cmpi ne, %11, %c0_i32_2 : i32
    scf.if %12 {
      %c0 = arith.constant 0 : index
      %c0_3 = arith.constant 0 : index
      %13 = vector.load %arg14[%c0, %c0_3] : memref<1x128xbf16, #tpu.memory_space<vmem>>, vector<1x128xbf16>
      %14 = vector.shape_cast %13 : vector<1x128xbf16> to vector<1x128xbf16>
      %15 = vector.broadcast %14 : vector<1x128xbf16> to vector<16x128xbf16>
      %c0_4 = arith.constant 0 : index
      %c0_5 = arith.constant 0 : index
      %c0_6 = arith.constant 0 : index
      %16 = vector.load %arg15[%c0_4, %c0_5, %c0_6] : memref<1x16x128xbf16, #tpu.memory_space<vmem>>, vector<1x16x128xbf16>
      %17 = vector.shape_cast %16 : vector<1x16x128xbf16> to vector<16x128xbf16>
      %18 = vector.shape_cast %15 : vector<16x128xbf16> to vector<1x16x128xbf16>
      tpu.vector_store %arg15[%c0_4, %c0_5, %c0_6], %18 {strides = array<i32>} : memref<1x16x128xbf16, #tpu.memory_space<vmem>>, vector<1x16x128xbf16>,
    } else {
    }
    return
  }
  func.func @transform_0(%arg0: i32, %arg1: i32, %arg2: memref<2xi32, #tpu.memory_space<smem>>) -> (i32, i32, i32) {
    %c0_i32 = arith.constant 0 : i32
    %c0_i32_0 = arith.constant 0 : i32
    return %arg0, %arg1, %c0_i32 : i32, i32, i32
  }
  func.func @transform_1(%arg0: i32, %arg1: i32, %arg2: memref<2xi32, #tpu.memory_space<smem>>) -> (i32, i32) {
    %c0_i32 = arith.constant 0 : i32
    %c0_i32_0 = arith.constant 0 : i32
    %c0_i32_1 = arith.constant 0 : i32
    return %c0_i32, %c0_i32_0 : i32, i32
  }
  func.func @transform_2(%arg0: i32, %arg1: i32, %arg2: memref<2xi32, #tpu.memory_space<smem>>) -> (i32, i32) {
    %c0_i32 = arith.constant 0 : i32
    %c0_i32_0 = arith.constant 0 : i32
    %c0_i32_1 = arith.constant 0 : i32
    return %c0_i32, %c0_i32_0 : i32, i32
  }
  func.func @transform_3(%arg0: i32, %arg1: i32, %arg2: memref<2xi32, #tpu.memory_space<smem>>) -> (i32, i32) {
    %c0_i32 = arith.constant 0 : i32
    %c0_i32_0 = arith.constant 0 : i32
    %c0_i32_1 = arith.constant 0 : i32
    return %c0_i32, %c0_i32_0 : i32, i32
  }
  func.func @transform_4(%arg0: i32, %arg1: i32, %arg2: memref<2xi32, #tpu.memory_space<smem>>) -> (i32, i32) {
    %c0_i32 = arith.constant 0 : i32
    %c0_i32_0 = arith.constant 0 : i32
    %c0_i32_1 = arith.constant 0 : i32
    return %c0_i32, %c0_i32_0 : i32, i32
  }
  func.func @transform_5(%arg0: i32, %arg1: i32, %arg2: memref<2xi32, #tpu.memory_space<smem>>) -> (i32, i32) {
    %c0_i32 = arith.constant 0 : i32
    %c0_i32_0 = arith.constant 0 : i32
    %c0_i32_1 = arith.constant 0 : i32
    return %c0_i32, %c0_i32_0 : i32, i32
  }
  func.func @transform_6(%arg0: i32, %arg1: i32, %arg2: memref<2xi32, #tpu.memory_space<smem>>) -> (i32, i32) {
    %c0_i32 = arith.constant 0 : i32
    %c0_i32_0 = arith.constant 0 : i32
    %c0_i32_1 = arith.constant 0 : i32
    return %c0_i32, %c0_i32_0 : i32, i32
  }
  func.func @transform_7(%arg0: i32, %arg1: i32, %arg2: memref<2xi32, #tpu.memory_space<smem>>) -> (i32, i32) {
    %c0_i32 = arith.constant 0 : i32
    %c0_i32_0 = arith.constant 0 : i32
    %c0_i32_1 = arith.constant 0 : i32
    return %c0_i32, %c0_i32_0 : i32, i32
  }
  func.func @transform_8(%arg0: i32, %arg1: i32, %arg2: memref<2xi32, #tpu.memory_space<smem>>) -> (i32, i32) {
    %c0_i32 = arith.constant 0 : i32
    %c0_i32_0 = arith.constant 0 : i32
    %c0_i32_1 = arith.constant 0 : i32
    return %c0_i32, %c0_i32_0 : i32, i32
  }
  func.func @transform_9(%arg0: i32, %arg1: i32, %arg2: memref<2xi32, #tpu.memory_space<smem>>) -> (i32, i32) {
    %c0_i32 = arith.constant 0 : i32
    %c0_i32_0 = arith.constant 0 : i32
    %c0_i32_1 = arith.constant 0 : i32
    return %c0_i32, %c0_i32_0 : i32, i32
  }
  func.func @transform_10(%arg0: i32, %arg1: i32, %arg2: memref<2xi32, #tpu.memory_space<smem>>) -> (i32, i32) {
    %c0_i32 = arith.constant 0 : i32
    %c0_i32_0 = arith.constant 0 : i32
    %c0_i32_1 = arith.constant 0 : i32
    return %c0_i32, %c0_i32_0 : i32, i32
  }
  func.func @transform_11(%arg0: i32, %arg1: i32, %arg2: memref<2xi32, #tpu.memory_space<smem>>) -> (i32, i32) {
    %c0_i32 = arith.constant 0 : i32
    %c0_i32_0 = arith.constant 0 : i32
    %c0_i32_1 = arith.constant 0 : i32
    return %c0_i32, %c0_i32_0 : i32, i32
  }
  func.func @transform_12(%arg0: i32, %arg1: i32, %arg2: memref<2xi32, #tpu.memory_space<smem>>) -> (i32, i32, i32) {
    %c0_i32 = arith.constant 0 : i32
    %c0_i32_0 = arith.constant 0 : i32
    return %arg0, %arg1, %c0_i32 : i32, i32, i32
  }
}

</mosaic_0001>

<bundles_post_ra>
// kernel: tpu_custom_call.1
= control target key start
LH: loop header
LB: loop body
LE: loop exit
PB: predicated region body
PF: predicated region fallthrough
CT: control target
= control target key end

     0   :  { %s2141_s0 = inlined_call_operand.vmem [shape: s32[2], index: 0, kind: input, shape index: {}]   ;;  %s2142_s1 = inlined_call_operand.hbm [shape: f32[2,32,40], index: 1, kind: input, shape index: {}]   ;;  %s2143_s2 = inlined_call_operand.vmem [shape: bf16[40,32], index: 2, kind: input, shape index: {}]   ;;  %s2144_s3 = inlined_call_operand.vmem [shape: f32[1,32], index: 3, kind: input, shape index: {}]   ;;  %s2145_s4 = inlined_call_operand.vmem [shape: bf16[96,64], index: 4, kind: input, shape index: {}]   ;;  %s2146_s5 = inlined_call_operand.vmem [shape: f32[1,64], index: 5, kind: input, shape index: {}]   ;;  %s2147_s6 = inlined_call_operand.vmem [shape: f32[1,64], index: 6, kind: input, shape index: {}]   ;;  %s2148_s7 = inlined_call_operand.vmem [shape: bf16[192,128], index: 7, kind: input, shape index: {}]   ;;  %s2149_s8 = inlined_call_operand.vmem [shape: f32[1,128], index: 8, kind: input, shape index: {}]   ;;  %s2150_s9 = inlined_call_operand.vmem [shape: f32[1,128], index: 9, kind: input, shape index: {}]   ;;  %s2151_s10 = inlined_call_operand.hbm [shape: bf16[128,128], index: 10, kind: input, shape index: {}]   ;;  %s2152_s11 = inlined_call_operand.vmem [shape: f32[1,128], index: 11, kind: input, shape index: {}]   ;;  %s2153_s12 = inlined_call_operand.vmem [shape: bf16[1,128], index: 12, kind: input, shape index: {}]   ;;  %s2154_s13 = inlined_call_operand.hbm [shape: bf16[2,32,128], index: 13, kind: output, shape index: {}]  }
   0x1   :  { %2164 = sst [smem:[#allocation21_spill]] %s2146_s5  ;;  %s18_s27 = sshll.u32 %s2141_s0, 4  ;;  %s19_s27 = int_to_ptr.vmem [resolvable:$true] %s18_s27 }
   0x2   :  { %2165 = sst [smem:[#allocation22_spill]] %s2147_s6  ;;  %s1539_s28 = scalar_lea.vmem %s19_s27, 16 }
   0x3   :  { %2166 = sst [smem:[#allocation23_spill]] %s2148_s7  ;;  %p1540_p0 = scmp.ne.s32.totalorder %s19_s27, %s1539_s28 }
   0x4   :  { %2167 = sst [smem:[#allocation24_spill]] %s2149_s8  ;;  %p1544_p1 = scmp.lt.s32.totalorder %s19_s27, %s19_s27 }
   0x5   :  { %2168 = sst [smem:[#allocation25_spill]] %s2150_s9  ;;  %p1545_p2 = scmp.lt.s32.totalorder %s1539_s28, %s1539_s28 }
   0x6   :  { %2169 = sst [smem:[#allocation26_spill]] %s2151_s10 }
   0x7   :  { %2170 = sst [smem:[#allocation27_spill]] %s2152_s11  ;;  %p1546_p3 = por %p1545_p2, %p1544_p1 }
   0x8   :  { %2171 = sst [smem:[#allocation28_spill]] %s2153_s12 }
   0x9   :  { %2172 = sst [smem:[#allocation29_spill]] %s2154_s13  ;;  %p1547_p4 = pnand %p1546_p3, %p1540_p0 }
   0xb   :  { %1550 = shalt.err (!%p1547_p4)  }
   0xc   :  { %s1709_s29 = smov [#allocation5]  }
   0xd   :  { %21 = dma.vmem_to_smem %s19_s27, 16, %s1709_s29, [#allocation4] }
   0xe   :  { %1663 = dma.done.wait [#allocation4], 16 }
   0xf   :  { %1664 = vsyncadd [#allocation4], 4294967280 }
  0x10   :  { %23 = sfence }
  0x11   :  { %24 = vsyncpa [#allocation7], 0 }
  0x12   :  { %26 = vsyncpa [#allocation7 + $0x1], 0 }
  0x13   :  { %27 = vsyncpa [#allocation10], 0 }
  0x14   :  { %28 = vsyncpa [#allocation8], 0 }
  0x15   :  { %30 = vsyncpa [#allocation8 + $0x1], 0  ;;  %s1798_s30 = smov 0   ;;  %s1800_s0 = smov 0  }
  0x16   :  { %s1802_s14 = smov 0   ;;  %s1804_s15 = smov 0  }
  0x17   :  { %s1806_s16 = smov 0   ;;  %s1808_s17 = smov 0  }
  0x18   :  { %s1810_s18 = smov 0   ;;  %s1812_s19 = smov 0  }
  0x19 LB: > { %2173 = sst [smem:[#allocation16_spill]] %s1679_s30  ;;  %s1248_s20 = sadd.s32 4294967295, %s1707_s19   ;;  %s1707_s19 = sphi %s1812_s19, %s36_s19   ;;  %s1703_s18 = sphi %s1810_s18, %s2208_s18   ;;  %s1699_s17 = sphi %s1808_s17, %s2202_s17   ;;  %s1695_s16 = sphi %s1806_s16, %s2207_s16   ;;  %s1691_s15 = sphi %s1804_s15, %s2201_s15   ;;  %s1687_s14 = sphi %s1802_s14, %s2206_s14   ;;  %s1683_s0 = sphi %s1800_s0, %s2205_s0   ;;  %s1679_s30 = sphi %s1798_s30, %s2204_s30  }
  0x1a   : > { %2174 = sst [smem:[#allocation17_spill]] %s1699_s17  ;;  %s1249_s21 = sadd.s32 4294967294, %s1707_s19  }
  0x1b   : > { %p70_p5 = scmp.ne.s32.totalorder %s1683_s0, %s1679_s30  ;;  %p1842_p6 = scmp.eq.s32.totalorder %s1248_s20, 0 }
  0x1c   : > { %p1846_p7 = scmp.eq.s32.totalorder %s1248_s20, 3  ;;  %p333_p8 = scmp.eq.s32.totalorder %s1249_s21, 3 }
  0x1d   : > { %p1852_p9 = por %p1842_p6, %p70_p5  ;;  %p1250_p10 = scmp.ge.s32.totalorder %s1707_s19, 1 }
  0x1e   : > { %p1857_p11 = por %p333_p8, %p70_p5  ;;  %p340_p12 = scmp.lt.s32.totalorder %s1707_s19, 5 }
  0x1f   : > { %s2177_s24 = scalar_select %p1852_p9, 1, 0 }
  0x20   : > { %s2178_s25 = scalar_select %p1857_p11, 1, 0 }
  0x21   : > { %p1862_p13 = pnand %p1250_p10, %p340_p12  ;;  %s1710_s27 = smov [#allocation9]  }
  0x22   : > { %2179 = sst [smem:[#allocation18_spill]] %s2178_s25  ;;  %s376_s28 = sshll.u32 %s1710_s27, 4  ;;  %s377_s28 = int_to_ptr.vmem [resolvable:$true] %s376_s28 }
  0x23   : > { %p1410_p0 = pneg %p1862_p13  ;;  %s1562_s29 = scalar_lea.vmem %s377_s28, 1024 }
  0x24   : > { %p1563_p3 = scmp.ne.s32.totalorder %s377_s28, %s1562_s29  ;;  %p1570_p8 = scmp.lt.s32.totalorder %s377_s28, %s377_s28 }
  0x25   : > { %p1411_p1 = pnand %p1410_p0, %p1842_p6  ;;  %p1571_p11 = scmp.lt.s32.totalorder %s1562_s29, %s1562_s29 }
  0x27   : > { %p1553_p2 = pneg %p1411_p1  ;;  %p1572_p9 = por %p1571_p11, %p1570_p8 }
  0x29   : > { %p1565_p4 = pnand %p1563_p3, %p1553_p2 }
  0x2b   : > { %p1566_p5 = pneg %p1565_p4 }
  0x2d   : > { %p1573_p10 = pnand %p1572_p9, %p1566_p5 }
  0x2f   : > { %1576 = shalt.err (!%p1573_p10)
}
  0x30   : > { %s1711_s20 = smov 64   ;;  %s1712_s21 = smov 4  }
  0x31   : > { %s2181_s10 = sld [smem:[#allocation26_spill]]  ;;  %s45_s29 = sadd.s32 1, %s1699_s17 }
  0x32   : > { %p46_p9 = scmp.ge.s32.totalorder %s45_s29, 2  ;;  %s48_s30 = sadd.s32 1, %s1703_s18 }
  0x33   : > { %s57_s13 = sadd.s32 1, %s1687_s14  ;;  %p64_p11 = scmp.ne.s32.totalorder %s1687_s14, %s1683_s0 }
  0x34   : > { %s2210_s29 = smov (%p46_p9, %s45_s29), 0  ;;  %s2212_s30 = smov (!%p46_p9, %s48_s30), %s1703_s18 }
  0x35   : > { %2182 = sst [smem:[#allocation19_spill]] %s2210_s29  ;;  %s53_s12 = ssub.s32 %s1699_s17, %s2210_s29 }
  0x36   : > { %p65_p12 = scmp.eq.s32.totalorder %s1707_s19, 0  ;;  %p50_p0 = scmp.ge.s32.totalorder %s2212_s30, 2 }
  0x37   : > { %1413 = dma.hbm_to_vmem [thread:$0]  (!%p1411_p1), %s2181_s10, 1024, %s377_s28, [#allocation10], %s1711_s20, %s1711_s20, %s1712_s21  }
  0x38   : > { %p1886_p2 = por %p1846_p7, %p64_p11  ;;  %p1890_p1 = por %p65_p12, %p64_p11 }
  0x39   : > { %p1423_p3 = scmp.lt.s32.totalorder %s1707_s19, 4  ;;  %s2214_s30 = smov (%p50_p0, %s2212_s30), 0 }
  0x3a   : > { %s2183_s25 = scalar_select %p1886_p2, 1, 0 }
  0x3b   : > { %s396_s20 = sand.u32 1, %s1687_s14   ;;  %s1254_s21 = sshll.u32 %s1699_s17, 1 }
  0x3c   : > { %2184 = sst [smem:[#allocation20_spill]] %s2183_s25  ;;  %s52_s27 = ssub.s32 %s1703_s18, %s2214_s30 }
  0x3d   : > { %s54_s10 = sor.u32 %s53_s12, %s52_s27  ;;  %s1253_s29 = sshll.u32 %s396_s20, 4 }
  0x3e   : > { %p55_p4 = scmp.eq.s32.totalorder %s54_s10, 0  ;;  %s1255_s23 = sshll.u32 %s1703_s18, 2 }
  0x3f   : > { %s400_s11 = scalar_lea.vmem [#allocation6], %s1253_s29  ;;  %s406_s8 = sadd.s32 %s1255_s23, %s1254_s21 }
  0x40   : > { %s409_s9 = sshll.u32 %s400_s11, 4  ;;  %s1256_s6 = sshll.u32 %s406_s8, 7  ;;  %s410_s9 = int_to_ptr.vmem [resolvable:$true] %s409_s9 }
  0x41   : > { %s1903_s25 = scalar_select %p55_p4, %s1687_s14, %s57_s13  }
  0x42   : > { %p1909_p7 = pnand %p1423_p3, %p1890_p1  ;;  %s408_s12 = scalar_lea.hbm %s2142_s1, %s1256_s6 }
  0x43   : > { %s397_s10 = scalar_lea.sflag [#allocation7], %s396_s20  ;;  %s1590_s11 = scalar_lea.vmem %s410_s9, 256 }
  0x44   : > { %p1579_p5 = pneg %p1909_p7  ;;  %p1591_p8 = scmp.ne.s32.totalorder %s410_s9, %s1590_s11 }
  0x45   : > { %s1713_s13 = smov [#allocation6]  }
  0x46   : > { %p1593_p10 = pnand %p1591_p8, %p1579_p5  ;;  %s1595_s8 = sshll.u32 %s1713_s13, 4  ;;  %s1596_s8 = int_to_ptr.vmem [resolvable:$false] %s1595_s8 }
  0x47   : > { %s1597_s29 = scalar_lea.vmem %s1596_s8, 512  ;;  %p1598_p11 = scmp.lt.s32.totalorder %s410_s9, %s1596_s8 }
  0x48   : > { %p1594_p9 = pneg %p1593_p10  ;;  %p1599_p12 = scmp.lt.s32.totalorder %s1597_s29, %s1590_s11 }
  0x4a   : > { %p1600_p0 = por %p1599_p12, %p1598_p11 }
  0x4c   : > { %p1601_p1 = pnand %p1600_p0, %p1594_p9 }
  0x4e   : > { %1604 = shalt.err (!%p1601_p1)
}
  0x4f   : > { %s1714_s28 = smov 128   ;;  %s1715_s7 = smov 8  }
  0x50   : > { %1417 = dma.hbm_to_vmem [thread:$0]  (!%p1909_p7), %s408_s12, 256, %s410_s9, %s397_s10, %s1714_s28, %s1714_s28, %s1715_s7  }
  0x51   : > { %421 = sbr.rel (%p1862_p13) target bundleno = 1256 (0x4e8), region = 68  ;;  %s1923_s6 = sand.u32 (!%p1862_p13), 1, %s1683_s0  }
  0x52   : > { %s1258_s17 = sshll.u32 (!%p1862_p13), %s1923_s6, 4  ;;  %s424_s20 = scalar_lea.sflag (!%p1862_p13), [#allocation7], %s1923_s6 }
  0x53   : > { %s1927_s21 = scalar_lea.vmem (!%p1862_p13), [#allocation6], %s1258_s17  ;;  %p2187_p3 = scmp.ne.s32.totalorder (!%p1862_p13), %s2177_s24, 0 }
  0x56   : > { %1666 = dma.done.wait (%p2187_p3), %s424_s20, 256  }
  0x57   : > { %1668 = vsyncadd (%p2187_p3), %s424_s20, 4294967040 }
  0x58   : > { %1670 = dma.done.wait (%p1842_p6), [#allocation10], 1024  }
  0x59   : > { %1672 = vsyncadd (%p1842_p6), [#allocation10], 4294966272  ;;  %s1260_s5 = sshll.u32 %s1923_s6, 3  ;;  %s1939_s9 = sld [smem:[#allocation5 + %s1695_s16]] }
  0x5a   : > { %s1941_s26 = scalar_lea.vmem [#allocation11], %s1260_s5  ;;  %p1261_p13 = scmp.ne.s32.totalorder %s1691_s15, 0 }
  0x5c   : > { %479 = sbr.rel (%p1261_p13) target bundleno = 100 (0x64), region = 80 }
  0x61   : > { %vm480_vm0 = vcmask 257024   ;;  %vm483_vm1 = vcmask 519168   ;;  %v1716_v0 = vmov 0  }
  0x62   : > { %482 = vst.msk [vmem:[#allocation2 + $0x4] sm:$0xf] %vm480_vm0, %v1716_v0 }
  0x63   : > { %485 = vst.msk [vmem:[#allocation3 + $0x4] sm:$0xf] %vm483_vm1, %v1716_v0 }
  0x64 PF: > { %s1945_s22 = sshll.u32 %s1691_s15, 4  ;;  %s487_s24 = sadd.s32 4, %s1939_s9 }
  0x65   : > { %p1263_p6 = scmp.ge.s32.totalorder %s1945_s22, %s487_s24 }
  0x66   : > { %s1719_s8 = smov (!%p1263_p6), 64   ;;  %s1720_s29 = smov (!%p1263_p6), 32  }
  0x67   : > { %492 = sbr.rel (%p1263_p6) target bundleno = 1212 (0x4bc), region = 84  ;;  %s2188_s17 = sld [smem:[#allocation23_spill]] (!%p1263_p6) }
  0x68   : > { %s2190_s7 = sld [smem:[#allocation21_spill]] (!%p1263_p6) }
  0x69   : > { %s2191_s5 = sld [smem:[#allocation22_spill]] (!%p1263_p6) }
  0x6a   : > { %s2192_s10 = sld [smem:[#allocation24_spill]] (!%p1263_p6) }
  0x6c   : > { %v1504_v1 = vld [vmem:[%s2143_s2 + $0x10] ss:$0 sps:$4 sm:$0xff]   ;;  %vm527_vm2 = vcmask 1043456   ;;  %v1717_v2 = vmov 0.0   ;;  %vm1718_vm3 = vmmov 0   ;;  %v1505_v4 = vld [vmem:[%s2143_s2 + $0x8] sm:$0xff]   ;;  %v574_v12 = vlaneseq }
  0x6d   : > { %1356 = vmatprep.subr.bf16.mxu0 %v1717_v2  ;;  %1366 = vmatprep.subr.bf16.mxu1 %v1717_v2  ;;  %v529_v3 = vsel %vm527_vm2, %v1504_v1, 0  ;;  %vm523_vm4 = vcmask 326656   ;;  %v1506_v5 = vld [vmem:[%s2143_s2] sm:$0xff]   ;;  %v494_v7 = vld [vmem:[%s1927_s21 + $0x8] sm:$0xff]  ;;  %v577_v14 = vstv %s1945_s22  ;;  %v580_v18 = vstv %s1939_s9  ;;  %s2189_s20 = smov %s2188_s17 }
  0x6e   : > { %1362 = vmatprep.mubr.msk.bf16.mxu0 %vm1718_vm3, %v1717_v2  ;;  %1378 = vmatprep.mubr.msk.bf16.mxu1 %vm1718_vm3, %v1717_v2  ;;  %v493_v6 = vld [vmem:[%s1927_s21] sm:$0xff]  ;;  %v1509_v9 = vld [vmem:[%s2145_s4 + $0x28] sm:$0xff]   ;;  %v1511_v11 = vld [vmem:[%s2145_s4 + $0x18] sm:$0xff]   ;;  %v575_v13 = vshrl.u32 %v574_v12, 7  ;;  %vm597_vm6 = vcmask 257024   ;;  %vm1111_vm8 = vcmask 257027  }
  0x6f   : > { %1357 = vmatpush3.bf16.msra.mxu0 %v529_v3  ;;  %v495_v8 = vpack.c.bf16 %v494_v7, %v493_v6  ;;  %1367 = vmatpush3.bf16.msra.mxu1 %v1509_v9  ;;  %v1510_v10 = vld [vmem:[%s2145_s4 + $0x20] sm:$0xff]   ;;  %v1512_v33 = vld [vmem:[%s2145_s4 + $0x10] sm:$0xff]   ;;  %v1513_v34 = vld [vmem:[%s2145_s4 + $0x8] sm:$0xff]   ;;  %vm615_vm9 = vsmask.f32 7424  ;;  %vm639_vm10 = vcmask 261120  }
  0x70   : > { %1358 = vmatprep.subr.bf16.mxu0 %v1717_v2  ;;  %1368 = vmatprep.subr.bf16.mxu1 %v1717_v2  ;;  %v1264_v15 = vld [vmem:[%s2144_s3] ss:$0 sm:$0xff]  ;;  %v578_v16 = vadd.s32 %v577_v14, %v575_v13  ;;  %v576_v17 = vadd.s32 8, %v575_v13  ;;  %v600_v31 = vld [vmem:[#allocation2 + $0x4] sm:$0x8]  ;;  %vm645_vm11 = vcmask 523264  }
  0x71   : > { %v1515_v39 = vld [vmem:[%s2145_s4] sm:$0xff]   ;;  %vm663_vm12 = vcmask 1044480   ;;  %vm703_vm13 = vcmask 785408   ;;  %v1518_v62 = vld [vmem:[%s2188_s17 + $0x38] sm:$0xff]   ;;  %v1721_v63 = vmov 0   ;;  %v1519_v0 = vld [vmem:[%s2189_s20 + $0x30] sm:$0xff]  }
  0x72   : > { %vm581_vm5 = vcmp.lt.s32.totalorder %v578_v16, %v580_v18  ;;  %v579_v22 = vadd.s32 %v577_v14, %v576_v17  ;;  %v1520_v1 = vld [vmem:[%s2189_s20 + $0x28] sm:$0xff]   ;;  %v1521_v3 = vld [vmem:[%s2189_s20 + $0x20] sm:$0xff]   ;;  %v1527_v9 = vld [vmem:[%s2189_s20 + $0x50] sm:$0xff]   ;;  %vm776_vm14 = vcmask 519168   ;;  %vm1113_vm15 = vcmask 519171   ;;  %s2194_s17 = sld [smem:[#allocation27_spill]] }
  0x73   : > { %1359 = vmatpush3.bf16.msra.mxu0 %v1505_v4  ;;  %1369 = vmatpush3.bf16.msra.mxu1 %v1510_v10  ;;  %v1522_v4 = vld [vmem:[%s2189_s20 + $0x18] sm:$0xff]   ;;  %v1524_v6 = vld [vmem:[%s2189_s20 + $0x8] sm:$0xff]   ;;  %v1525_v7 = vld [vmem:[%s2189_s20] sm:$0xff]  }
  0x74   : > { %1360 = vmatprep.subr.bf16.mxu0 %v1717_v2  ;;  %1370 = vmatprep.subr.bf16.mxu1 %v1717_v2  ;;  %vm582_vm7 = vcmp.lt.s32.totalorder %v579_v22, %v580_v18  ;;  %v1528_v10 = vld [vmem:[%s2189_s20 + $0x48] sm:$0xff]   ;;  %v1283_v13 = vld [vmem:[%s2191_s5] ss:$0 sm:$0xff] }
  0x77   : > { %1361 = vmatpush3.bf16.msra.mxu0 %v1506_v5  ;;  %1371 = vmatpush3.bf16.msra.mxu1 %v1511_v11  ;;  %v1523_v5 = vld [vmem:[%s2189_s20 + $0x10] sm:$0xff]   ;;  %v1282_v11 = vld [vmem:[%s2190_s7] ss:$0 sm:$0xff] }
  0x78   : > { %1372 = vmatprep.subr.bf16.mxu1 %v1717_v2  ;;  %927 = vmatprep.subr.bf16.mxu0 %v1721_v63 }
  0x7a   : > { %1363 = vmatmul.mubr.msk.bf16.vlgmr.msra.gmra.mxu0 %vm523_vm4, %v495_v8  ;;  %v1526_v8 = vld [vmem:[%s2189_s20 + $0x58] sm:$0xff]  }
  0x7b   : > { %1373 = vmatpush3.bf16.msra.mxu1 %v1512_v33  ;;  %928 = vmatpush1.bf16.msra.mxu0 %v1518_v62 }
  0x7c   : > { %1374 = vmatprep.subr.bf16.mxu1 %v1717_v2  ;;  %929 = vmatprep.subr.bf16.mxu0 %v1721_v63 }
  0x7f   : > { %1375 = vmatpush3.bf16.msra.mxu1 %v1513_v34  ;;  %930 = vmatpush1.bf16.msra.mxu0 %v1519_v0 }
  0x80   : > { %1376 = vmatprep.subr.bf16.mxu1 %v1717_v2  ;;  %931 = vmatprep.subr.bf16.mxu0 %v1721_v63 }
  0x83   : > { %1377 = vmatpush3.bf16.msra.mxu1 %v1515_v39  ;;  %932 = vmatpush1.bf16.msra.mxu0 %v1520_v1 }
  0x84   : > { %1382 = vmatprep.subr.bf16.mxu1 %v1717_v2  ;;  %933 = vmatprep.subr.bf16.mxu0 %v1721_v63 }
  0x87   : > { %934 = vmatpush1.bf16.msra.mxu0 %v1521_v3 }
  0x88   : > { %935 = vmatprep.subr.bf16.mxu0 %v1721_v63 }
  0x8b   : > { %936 = vmatpush1.bf16.msra.mxu0 %v1522_v4 }
  0x8c   : > { %937 = vmatprep.subr.bf16.mxu0 %v1721_v63 }
  0x8f   : > { %938 = vmatpush1.bf16.msra.mxu0 %v1523_v5 }
  0x90   : > { %939 = vmatprep.subr.bf16.mxu0 %v1721_v63 }
  0x93   : > { %940 = vmatpush1.bf16.msra.mxu0 %v1524_v6 }
  0x94   : > { %941 = vmatprep.subr.bf16.mxu0 %v1721_v63 }
  0x97   : > { %942 = vmatpush1.bf16.msra.mxu0 %v1525_v7  ;;  %v1306_v7 = vld [vmem:[%s2194_s17] ss:$0 sm:$0xff] }
  0x98   : > { %951 = vmatprep.subr.bf16.mxu0 %v1721_v63 }
  0x9b   : > { %952 = vmatpush2.bf16.msra.mxu0 %v1526_v8 }
  0x9c   : > { %953 = vmatprep.subr.bf16.mxu0 %v1721_v63 }
  0x9f   : > { %954 = vmatpush2.bf16.msra.mxu0 %v1527_v9 }
  0xa0   : > { %955 = vmatprep.subr.bf16.mxu0 %v1721_v63 }
  0xa3   : > { %956 = vmatpush2.bf16.msra.mxu0 %v1528_v10 }
  0xa4   : > { %957 = vmatprep.subr.bf16.mxu0 %v1721_v63 }
 0x13a   : > { %v565_v19 = vpop.f32.mrf.mxu0 }
 0x13b   : > { %v566_v20 = vadd.f32 %v1264_v15, %v565_v19 }
 0x13c   : > { %v1364_v21 = vpop.f32.mrf.mxu0 }
 0x13d   : > { %v572_v23 = vmax.f32 %v566_v20, 0.0 }
 0x13e   : > { %v568_v24 = vpop.f32.mrf.mxu0 }
 0x13f   : > { %v587_v25 = vsel %vm581_vm5, %v572_v23, 0.0  ;;  %v569_v26 = vadd.f32 %v1264_v15, %v568_v24  ;;  %v779_v24 = vld [vmem:[#allocation3 + $0x4] sm:$0x8] }
 0x140   : > { %v1325_v27 = vpack.c.bf16 %v587_v25, %v587_v25  ;;  %v1365_v28 = vpop.f32.mrf.mxu0 }
 0x141   : > { %v573_v29 = vmax.f32 %v569_v26, 0.0 }
 0x142   : > { %598 = vst.msk [vmem:[#allocation2 + $0x8] sm:$0xf] %vm597_vm6, %v1325_v27  ;;  %v1530_v27 = vld [vmem:[%s2189_s20 + $0x40] sm:$0xff]  }
 0x143   : > { %v588_v30 = vsel %vm582_vm7, %v573_v29, 0.0  ;;  %958 = vmatpush2.bf16.msra.mxu0 %v1530_v27 }
 0x144   : > { %v1326_v32 = vpack.c.bf16 %v588_v30, %v588_v30 }
 0x146   : > { %599 = vst.msk [vmem:[#allocation2 + $0xc] sm:$0xf] %vm597_vm6, %v1326_v32 }
 0x147   : > { %1112 = vst.msk [vmem:[#allocation2 + $0x4] sm:$0x8] %vm1111_vm8, %v1326_v32 }
 0x149   : > { %v601_v35 = vld [vmem:[#allocation2 + $0x8] sm:$0xf] }
 0x14a   : > { %v1271_v36 = vcombine.low %v600_v31, %v601_v35  ;;  %v1531_v31 = vld [vmem:[#allocation9 + $0x38] sm:$0xff]  }
 0x14c   : > { %v619_v37 = vshll.u32 %v1271_v36, 16  ;;  %v617_v44 = vshrl.u32 %v1271_v36, 16 }
 0x14d   : > { %v603_v38 = vld [vmem:[#allocation2 + $0xc] sm:$0xf] }
 0x14e   : > { %v1274_v40 = vcombine.low %v601_v35, %v603_v38  ;;  %v1273_v41 = vcombine.low %v603_v38, %v603_v38  ;;  %v621_v42 = vrot.slane %v619_v37, 1  ;;  %v1514_v54 = vld [vmem:[#allocation2 + $0xc] ss:$0 sps:$4 sm:$0x77]   ;;  %v1532_v35 = vld [vmem:[#allocation9 + $0x30] sm:$0xff]  }
 0x150   : > { %v636_v43 = vrot.slane %v1274_v40, 5  ;;  %v624_v45 = vshll.u32 %v1273_v41, 16  ;;  %v622_v46 = vor.u32 %v621_v42, %v617_v44  ;;  %v628_v49 = vshrl.u32 %v1273_v41, 16  ;;  %v1533_v41 = vld [vmem:[#allocation9 + $0x28] sm:$0xff]   ;;  %v1534_v44 = vld [vmem:[#allocation9 + $0x20] sm:$0xff]  }
 0x152   : > { %637 = vrot.lane.b32.xlu1 %v636_v43, %s1719_s8  ;;  %v626_v47 = vrot.slane %v624_v45, 1  ;;  %v1535_v45 = vld [vmem:[#allocation9 + $0x18] sm:$0xff]  }
 0x154   : > { %v627_v48 = vsel %vm615_vm9, %v622_v46, %v626_v47  ;;  %v630_v50 = vor.u32 %v628_v49, %v626_v47 }
 0x155   : > { %631 = vrot.lane.b32.xlu0 %v627_v48, %s1720_s29 }
 0x159   : > { %633 = vrot.lane.b32.xlu0 %v630_v50, %s1720_s29  ;;  %s2193_s29 = sld [smem:[#allocation25_spill]] }
 0x1c4   : > { %v638_v53 = vpop.permute.xlu1 %637 }
 0x1c7   : > { %v632_v51 = vpop.permute.xlu0 %631 }
 0x1c8   : > { %v641_v52 = vsel %vm639_vm10, %v1271_v36, %v632_v51 }
 0x1c9   : > { %v647_v55 = vsel %vm645_vm11, %v641_v52, %v638_v53 }
 0x1ca   : > { %v664_v59 = vrot.slane %v647_v55, 3  ;;  %v1537_v55 = vld [vmem:[#allocation9 + $0x8] sm:$0xff]  }
 0x1cb   : > { %v634_v56 = vpop.permute.xlu0 %633 }
 0x1cc   : > { %v644_v57 = vsel %vm639_vm10, %v1514_v54, %v634_v56  ;;  %v1536_v54 = vld [vmem:[#allocation9 + $0x10] sm:$0xff]   ;;  %v1538_v56 = vld [vmem:[#allocation9] sm:$0xff]  }
 0x1cd   : > { %v648_v58 = vsel %vm645_vm11, %v644_v57, %v638_v53  ;;  %v1304_v57 = vld [vmem:[%s2192_s10] ss:$0 sm:$0xff] }
 0x1ce   : > { %v665_v60 = vrot.slane %v648_v58, 3 }
 0x1d0   : > { %v666_v61 = vsel %vm663_vm12, %v664_v59, %v665_v60  ;;  %v1305_v60 = vld [vmem:[%s2193_s29] ss:$0 sm:$0xff] }
 0x1d1   : > { %1379 = vmatmul.mubr.msk.bf16.vlgmr.msra.gmra.mxu1 %vm703_vm13, %v666_v61 }
 0x1d2   : > { %1398 = vmatprep.mubr.msk.bf16.mxu1 %vm1718_vm3, %v1717_v2  ;;  %1383 = vmatpush3.bf16.msra.mxu1 %v1531_v31 }
 0x1d3   : > { %1384 = vmatprep.subr.bf16.mxu1 %v1717_v2 }
 0x1d6   : > { %1385 = vmatpush3.bf16.msra.mxu1 %v1532_v35 }
 0x1d7   : > { %1386 = vmatprep.subr.bf16.mxu1 %v1717_v2 }
 0x1da   : > { %1387 = vmatpush3.bf16.msra.mxu1 %v1533_v41 }
 0x1db   : > { %1388 = vmatprep.subr.bf16.mxu1 %v1717_v2 }
 0x1de   : > { %1389 = vmatpush3.bf16.msra.mxu1 %v1534_v44 }
 0x1df   : > { %1390 = vmatprep.subr.bf16.mxu1 %v1717_v2 }
 0x1e2   : > { %1391 = vmatpush3.bf16.msra.mxu1 %v1535_v45 }
 0x1e3   : > { %1392 = vmatprep.subr.bf16.mxu1 %v1717_v2 }
 0x1e6   : > { %1393 = vmatpush3.bf16.msra.mxu1 %v1536_v54 }
 0x1e7   : > { %1394 = vmatprep.subr.bf16.mxu1 %v1717_v2 }
 0x1ea   : > { %1395 = vmatpush3.bf16.msra.mxu1 %v1537_v55 }
 0x1eb   : > { %1396 = vmatprep.subr.bf16.mxu1 %v1717_v2 }
 0x1ee   : > { %1397 = vmatpush3.bf16.msra.mxu1 %v1538_v56 }
 0x291   : > { %v741_v12 = vpop.f32.mrf.mxu1 }
 0x292   : > { %v755_v14 = vmul.f32 %v1282_v11, %v741_v12 }
 0x293   : > { %v1380_v15 = vpop.f32.mrf.mxu1 }
 0x294   : > { %v764_v16 = vadd.f32 %v1283_v13, %v755_v14 }
 0x295   : > { %v744_v17 = vpop.f32.mrf.mxu1 }
 0x296   : > { %v766_v18 = vmax.f32 %v764_v16, 0.0  ;;  %v756_v19 = vmul.f32 %v1282_v11, %v744_v17 }
 0x297   : > { %v1381_v20 = vpop.f32.mrf.mxu1 }
 0x298   : > { %v1327_v21 = vpack.c.bf16 %v766_v18, %v766_v18  ;;  %v765_v22 = vadd.f32 %v1283_v13, %v756_v19 }
 0x29a   : > { %777 = vst.msk [vmem:[#allocation3 + $0x8] sm:$0xf] %vm776_vm14, %v1327_v21  ;;  %v767_v23 = vmax.f32 %v765_v22, 0.0 }
 0x29c   : > { %v1328_v25 = vpack.c.bf16 %v767_v23, %v767_v23 }
 0x29e   : > { %778 = vst.msk [vmem:[#allocation3 + $0xc] sm:$0xf] %vm776_vm14, %v1328_v25 }
 0x29f   : > { %1114 = vst.msk [vmem:[#allocation3 + $0x4] sm:$0x8] %vm1113_vm15, %v1328_v25 }
 0x2a1   : > { %v780_v26 = vld [vmem:[#allocation3 + $0x8] sm:$0xf] }
 0x2a2   : > { %v1286_v28 = vcombine.low %v779_v24, %v780_v26 }
 0x2a4   : > { %v797_v29 = vshll.u32 %v1286_v28, 16  ;;  %v795_v36 = vshrl.u32 %v1286_v28, 16 }
 0x2a5   : > { %v782_v30 = vld [vmem:[#allocation3 + $0xc] sm:$0xf] }
 0x2a6   : > { %v1289_v32 = vcombine.low %v780_v26, %v782_v30  ;;  %v1288_v33 = vcombine.low %v782_v30, %v782_v30  ;;  %v799_v34 = vrot.slane %v797_v29, 1  ;;  %v1529_v47 = vld [vmem:[#allocation3 + $0xc] ss:$0 sps:$4 sm:$0x77]  }
 0x2a8   : > { %1303 = vmatprep.mubr.msk.bf16.mxu0 %vm645_vm11, %v1289_v32  ;;  %v802_v37 = vshll.u32 %v1288_v33, 16  ;;  %v800_v38 = vor.u32 %v799_v34, %v795_v36  ;;  %v806_v40 = vshrl.u32 %v1288_v33, 16 }
 0x2aa   : > { %v804_v39 = vrot.slane %v802_v37, 1 }
 0x2ac   : > { %v805_v42 = vsel %vm615_vm9, %v800_v38, %v804_v39  ;;  %v808_v43 = vor.u32 %v806_v40, %v804_v39 }
 0x2ad   : > { %809 = vrot.lane.b32.xlu1 %v805_v42, %s1719_s8 }
 0x2ae   : > { %811 = vrot.lane.b32.xlu0 %v808_v43, %s1719_s8 }
 0x31f   : > { %v810_v46 = vpop.permute.xlu1 %809 }
 0x320   : > { %v816_v48 = vsel %vm645_vm11, %v1286_v28, %v810_v46  ;;  %v812_v49 = vpop.permute.xlu0 %811 }
 0x321   : > { %v846_v50 = vrot.slane %v816_v48, 3  ;;  %v819_v51 = vsel %vm645_vm11, %v1529_v47, %v812_v49 }
 0x322   : > { %v847_v52 = vrot.slane %v819_v51, 3 }
 0x324   : > { %v848_v53 = vsel %vm663_vm12, %v846_v50, %v847_v52 }
 0x325   : > { %960 = vmatmul.mubr.bf16.vlgmr.msra.gmra.mxu0 %v848_v53 }
 0x3e5   : > { %v961_v58 = vpop.f32.mrf.mxu0 }
 0x3e6   : > { %v975_v59 = vmul.f32 %v1304_v57, %v961_v58 }
 0x3e7   : > { %v963_v61 = vpop.f32.mrf.mxu0 }
 0x3e8   : > { %v984_v63 = vadd.f32 %v1305_v60, %v975_v59 }
 0x3e9   : > { %v964_v62 = vpop.f32.mrf.mxu0 }
 0x3ea   : > { %v976_v0 = vmul.f32 %v1304_v57, %v964_v62  ;;  %v986_v2 = vmax.f32 %v984_v63, 0.0 }
 0x3eb   : > { %v966_v1 = vpop.f32.mrf.mxu0 }
 0x3ec   : > { %v985_v3 = vadd.f32 %v1305_v60, %v976_v0 }
 0x3ee   : > { %v987_v4 = vmax.f32 %v985_v3, 0.0 }
 0x3f0   : > { %v988_v5 = vpack.c.bf16 %v987_v4, %v986_v2 }
 0x3f2   : > { %1399 = vmatmul.mubr.bf16.vlgmr.msra.gmra.mxu1 %v988_v5 }
 0x4b2   : > { %v1094_v6 = vpop.f32.mrf.mxu1 }
 0x4b3   : > { %v1095_v10 = vadd.f32 %v1306_v7, %v1094_v6 }
 0x4b4   : > { %v1400_v8 = vpop.f32.mrf.mxu1 }
 0x4b6   : > { %v1097_v9 = vpop.f32.mrf.mxu1 }
 0x4b7   : > { %v1098_v11 = vadd.f32 %v1306_v7, %v1097_v9 }
 0x4b8   : > { %v1401_v12 = vpop.f32.mrf.mxu1 }
 0x4b9   : > { %v1334_v13 = vpack.c.bf16 %v1098_v11, %v1095_v10 }
 0x4bb   : > { %1335 = vst [vmem:[%s1941_s26] sm:$0xff] %v1334_v13  }
 0x4bc PF: > { %p1317_p4 = scmp.lt.s32.totalorder %s1945_s22, %s487_s24 }
 0x4bd   : > { %s2195_s27 = sld [smem:[#allocation28_spill]] (!%p1317_p4) }
 0x4be   : > { %1117 = sbr.rel (%p1317_p4) target bundleno = 1230 (0x4ce), region = 88 }
 0x4c3   : > { %v1118_v14 = vld [vmem:[%s2195_s27] sm:$0x1]  ;;  %v1122_v15 = vlaneseq }
 0x4c4   : > { %v1120_v16 = vpack.i.b16 %v1118_v14, %v1118_v14 }
 0x4c5   : > { %v1123_v17 = vshrl.u32 %v1122_v15, 7 }
 0x4c7   : > { %v1124_v18 = vsub.s32 0, %v1123_v17 }
 0x4c9   : > { %v1125_v19 = vrot.slane %v1120_v16, %v1124_v18 }
 0x4cb   : > { %v1318_v20 = vcombine.low %v1125_v19, %v1125_v19 }
 0x4cd   : > { %1130 = vst [vmem:[%s1941_s26] sm:$0xf] %v1318_v20  ;;  %1131 = vst [vmem:[%s1941_s26 + $0x4] sm:$0xf] %v1318_v20 }
 0x4ce PF: > { %s1320_s22 = sshll.u32 %s1691_s15, 1  ;;  %s1321_s24 = sshll.u32 %s1695_s16, 2 }
 0x4cf   : > { %s1148_s23 = sshll.u32 %s1941_s26, 4  ;;  %s1145_s8 = sadd.s32 %s1321_s24, %s1320_s22  ;;  %s2083_s23 = int_to_ptr.vmem [resolvable:$true] %s1148_s23 }
 0x4d0   : > { %s1322_s12 = sshll.u32 %s1145_s8, 6  ;;  %s2197_s13 = sld [smem:[#allocation29_spill]] }
 0x4d1   : > { %s1133_s28 = scalar_lea.sflag [#allocation8], %s1923_s6  ;;  %s1605_s7 = scalar_lea.vmem %s2083_s23, 128 }
 0x4d2   : > { %p1606_p7 = scmp.ne.s32.totalorder %s2083_s23, %s1605_s7  ;;  %s1722_s15 = smov [#allocation11]  }
 0x4d3   : > { %s1609_s16 = sshll.u32 %s1722_s15, 4  ;;  %s1610_s16 = int_to_ptr.vmem [resolvable:$false] %s1609_s16 }
 0x4d4   : > { %p1607_p5 = pnand %p1606_p7, %p1886_p2  ;;  %s1611_s26 = scalar_lea.vmem %s1610_s16, 256 }
 0x4d5   : > { %p1612_p10 = scmp.lt.s32.totalorder %s2083_s23, %s1610_s16  ;;  %p1613_p9 = scmp.lt.s32.totalorder %s1611_s26, %s1605_s7 }
 0x4d6   : > { %s2088_s29 = scalar_lea.hbm %s2197_s13, %s1322_s12  ;;  %p1608_p8 = pneg %p1607_p5 }
 0x4d7   : > { %p1614_p11 = por %p1613_p9, %p1612_p10 }
 0x4d9   : > { %p1615_p12 = pnand %p1614_p11, %p1608_p8 }
 0x4db   : > { %1618 = shalt.err (!%p1615_p12)
}
 0x4dc   : > { %s1619_s17 = scalar_lea.hbm %s2088_s29, 128  ;;  %s1623_s27 = scalar_lea.hbm %s2197_s13, 512 }
 0x4dd   : > { %p1620_p0 = scmp.ne.s32.totalorder %s2088_s29, %s1619_s17  ;;  %p1624_p13 = scmp.lt.s32.totalorder %s2088_s29, %s2197_s13 }
 0x4de   : > { %p1625_p6 = scmp.lt.s32.totalorder %s1623_s27, %s1619_s17 }
 0x4df   : > { %p1621_p1 = pnand %p1620_p0, %p1886_p2 }
 0x4e0   : > { %p1626_p4 = por %p1625_p6, %p1624_p13 }
 0x4e1   : > { %p1622_p3 = pneg %p1621_p1 }
 0x4e3   : > { %p1627_p7 = pnand %p1626_p4, %p1622_p3 }
 0x4e5   : > { %1630 = shalt.err (!%p1627_p7)
}
 0x4e6   : > { %s1723_s8 = smov 64   ;;  %s1724_s12 = smov 4  }
 0x4e7   : > { %1408 = dma.vmem_to_hbm [thread:$0]  (%p1886_p2), %s2083_s23, 128, %s2088_s29, %s1133_s28, %s1723_s8, %s1723_s8, %s1724_s12  }
 0x4e8 PF: > { %s2198_s10 = sld [smem:[#allocation16_spill]]  ;;  %p1425_p5 = scmp.ge.s32.totalorder %s1707_s19, 2 }
 0x4e9   : > { %s2199_s11 = sld [smem:[#allocation18_spill]] }
 0x4ee   : > { %s1163_s7 = sand.u32 1, %s2198_s10  }
 0x4ef   : > { %p2200_p8 = scmp.ne.s32.totalorder %s2199_s11, 0  ;;  %s1164_s15 = scalar_lea.sflag [#allocation8], %s1163_s7 }
 0x4f1   : > { %p1419_p10 = pnand %p1425_p5, %p2200_p8 }
 0x4f3   : > { %p1420_p9 = pneg %p1419_p10 }
 0x4f5   : > { %1674 = dma.done.wait (%p1420_p9), %s1164_s15, 128  }
 0x4f6   : > { %1676 = vsyncadd (%p1420_p9), %s1164_s15, 4294967168  ;;  %s36_s19 = sadd.s32 1, %s1707_s19   ;;  %s2201_s15 = sld [smem:[#allocation17_spill]] }
 0x4f7   : > { %p33_p11 = scmp.ge.s32.totalorder %s36_s19, 6   ;;  %s2202_s17 = sld [smem:[#allocation19_spill]] }
 0x4f8   : > { %s2203_s6 = smov %s2214_s30  ;;  %s2204_s30 = smov %s1683_s0 }
 0x4f9   : > { %s2205_s0 = smov %s1687_s14  ;;  %s2206_s14 = smov %s1903_s25 }
 0x4fa   : > { %s2207_s16 = smov %s1703_s18  ;;  %s2208_s18 = smov %s2203_s6 }
 0x4fb   :  { %35 = sbr.rel (!%p33_p11) target bundleno = 25 (0x19), region = 129 }
 0x500   :  { %1169 = vsyncpa [#allocation7], 1 }
 0x501   :  { %1171 = vsyncpa [#allocation7 + $0x1], 1 }
 0x502   :  { %1172 = vsyncpa [#allocation10], 1 }
 0x503   :  { %1173 = vsyncpa [#allocation8], 1 }
 0x504   :  { %1175 = vsyncpa [#allocation8 + $0x1], 1 }

// kernel: tpu_custom_call.1
= control target key start
LH: loop header
LB: loop body
LE: loop exit
PB: predicated region body
PF: predicated region fallthrough
CT: control target
= control target key end

     0   :  { %s2141_s0 = inlined_call_operand.vmem [shape: s32[2], index: 0, kind: input, shape index: {}]   ;;  %s2142_s1 = inlined_call_operand.hbm [shape: f32[2,32,40], index: 1, kind: input, shape index: {}]   ;;  %s2143_s2 = inlined_call_operand.vmem [shape: bf16[40,32], index: 2, kind: input, shape index: {}]   ;;  %s2144_s3 = inlined_call_operand.vmem [shape: f32[1,32], index: 3, kind: input, shape index: {}]   ;;  %s2145_s4 = inlined_call_operand.vmem [shape: bf16[96,64], index: 4, kind: input, shape index: {}]   ;;  %s2146_s5 = inlined_call_operand.vmem [shape: f32[1,64], index: 5, kind: input, shape index: {}]   ;;  %s2147_s6 = inlined_call_operand.vmem [shape: f32[1,64], index: 6, kind: input, shape index: {}]   ;;  %s2148_s7 = inlined_call_operand.vmem [shape: bf16[192,128], index: 7, kind: input, shape index: {}]   ;;  %s2149_s8 = inlined_call_operand.vmem [shape: f32[1,128], index: 8, kind: input, shape index: {}]   ;;  %s2150_s9 = inlined_call_operand.vmem [shape: f32[1,128], index: 9, kind: input, shape index: {}]   ;;  %s2151_s10 = inlined_call_operand.hbm [shape: bf16[128,128], index: 10, kind: input, shape index: {}]   ;;  %s2152_s11 = inlined_call_operand.vmem [shape: f32[1,128], index: 11, kind: input, shape index: {}]   ;;  %s2153_s12 = inlined_call_operand.vmem [shape: bf16[1,128], index: 12, kind: input, shape index: {}]   ;;  %s2154_s13 = inlined_call_operand.hbm [shape: bf16[2,32,128], index: 13, kind: output, shape index: {}]  }
   0x1   :  { %2164 = sst [smem:[#allocation21_spill]] %s2146_s5  ;;  %s18_s27 = sshll.u32 %s2141_s0, 4  ;;  %s19_s27 = int_to_ptr.vmem [resolvable:$true] %s18_s27 }
   0x2   :  { %2165 = sst [smem:[#allocation22_spill]] %s2147_s6  ;;  %s1539_s28 = scalar_lea.vmem %s19_s27, 16 }
   0x3   :  { %2166 = sst [smem:[#allocation23_spill]] %s2148_s7  ;;  %p1540_p0 = scmp.ne.s32.totalorder %s19_s27, %s1539_s28 }
   0x4   :  { %2167 = sst [smem:[#allocation24_spill]] %s2149_s8  ;;  %p1544_p1 = scmp.lt.s32.totalorder %s19_s27, %s19_s27 }
   0x5   :  { %2168 = sst [smem:[#allocation25_spill]] %s2150_s9  ;;  %p1545_p2 = scmp.lt.s32.totalorder %s1539_s28, %s1539_s28 }
   0x6   :  { %2169 = sst [smem:[#allocation26_spill]] %s2151_s10 }
   0x7   :  { %2170 = sst [smem:[#allocation27_spill]] %s2152_s11  ;;  %p1546_p3 = por %p1545_p2, %p1544_p1 }
   0x8   :  { %2171 = sst [smem:[#allocation28_spill]] %s2153_s12 }
   0x9   :  { %2172 = sst [smem:[#allocation29_spill]] %s2154_s13  ;;  %p1547_p4 = pnand %p1546_p3, %p1540_p0 }
   0xb   :  { %1550 = shalt.err (!%p1547_p4)  }
   0xc   :  { %s1709_s29 = smov [#allocation5]  }
   0xd   :  { %21 = dma.vmem_to_smem %s19_s27, 16, %s1709_s29, [#allocation4] }
   0xe   :  { %1663 = dma.done.wait [#allocation4], 16 }
   0xf   :  { %1664 = vsyncadd [#allocation4], 4294967280 }
  0x10   :  { %23 = sfence }
  0x11   :  { %24 = vsyncpa [#allocation7], 0 }
  0x12   :  { %26 = vsyncpa [#allocation7 + $0x1], 0 }
  0x13   :  { %27 = vsyncpa [#allocation10], 0 }
  0x14   :  { %28 = vsyncpa [#allocation8], 0 }
  0x15   :  { %30 = vsyncpa [#allocation8 + $0x1], 0  ;;  %s1798_s30 = smov 0   ;;  %s1800_s0 = smov 0  }
  0x16   :  { %s1802_s14 = smov 0   ;;  %s1804_s15 = smov 0  }
  0x17   :  { %s1806_s16 = smov 0   ;;  %s1808_s17 = smov 0  }
  0x18   :  { %s1810_s18 = smov 0   ;;  %s1812_s19 = smov 0  }
  0x19 LB: > { %2173 = sst [smem:[#allocation16_spill]] %s1679_s30  ;;  %s1248_s20 = sadd.s32 4294967295, %s1707_s19   ;;  %s1707_s19 = sphi %s1812_s19, %s36_s19   ;;  %s1703_s18 = sphi %s1810_s18, %s2208_s18   ;;  %s1699_s17 = sphi %s1808_s17, %s2202_s17   ;;  %s1695_s16 = sphi %s1806_s16, %s2207_s16   ;;  %s1691_s15 = sphi %s1804_s15, %s2201_s15   ;;  %s1687_s14 = sphi %s1802_s14, %s2206_s14   ;;  %s1683_s0 = sphi %s1800_s0, %s2205_s0   ;;  %s1679_s30 = sphi %s1798_s30, %s2204_s30  }
  0x1a   : > { %2174 = sst [smem:[#allocation17_spill]] %s1699_s17  ;;  %s1249_s21 = sadd.s32 4294967294, %s1707_s19  }
  0x1b   : > { %p70_p5 = scmp.ne.s32.totalorder %s1683_s0, %s1679_s30  ;;  %p1842_p6 = scmp.eq.s32.totalorder %s1248_s20, 0 }
  0x1c   : > { %p1846_p7 = scmp.eq.s32.totalorder %s1248_s20, 3  ;;  %p333_p8 = scmp.eq.s32.totalorder %s1249_s21, 3 }
  0x1d   : > { %p1852_p9 = por %p1842_p6, %p70_p5  ;;  %p1250_p10 = scmp.ge.s32.totalorder %s1707_s19, 1 }
  0x1e   : > { %p1857_p11 = por %p333_p8, %p70_p5  ;;  %p340_p12 = scmp.lt.s32.totalorder %s1707_s19, 5 }
  0x1f   : > { %s2177_s24 = scalar_select %p1852_p9, 1, 0 }
  0x20   : > { %s2178_s25 = scalar_select %p1857_p11, 1, 0 }
  0x21   : > { %p1862_p13 = pnand %p1250_p10, %p340_p12  ;;  %s1710_s27 = smov [#allocation9]  }
  0x22   : > { %2179 = sst [smem:[#allocation18_spill]] %s2178_s25  ;;  %s376_s28 = sshll.u32 %s1710_s27, 4  ;;  %s377_s28 = int_to_ptr.vmem [resolvable:$true] %s376_s28 }
  0x23   : > { %p1410_p0 = pneg %p1862_p13  ;;  %s1562_s29 = scalar_lea.vmem %s377_s28, 1024 }
  0x24   : > { %p1563_p3 = scmp.ne.s32.totalorder %s377_s28, %s1562_s29  ;;  %p1570_p8 = scmp.lt.s32.totalorder %s377_s28, %s377_s28 }
  0x25   : > { %p1411_p1 = pnand %p1410_p0, %p1842_p6  ;;  %p1571_p11 = scmp.lt.s32.totalorder %s1562_s29, %s1562_s29 }
  0x27   : > { %p1553_p2 = pneg %p1411_p1  ;;  %p1572_p9 = por %p1571_p11, %p1570_p8 }
  0x29   : > { %p1565_p4 = pnand %p1563_p3, %p1553_p2 }
  0x2b   : > { %p1566_p5 = pneg %p1565_p4 }
  0x2d   : > { %p1573_p10 = pnand %p1572_p9, %p1566_p5 }
  0x2f   : > { %1576 = shalt.err (!%p1573_p10)
}
  0x30   : > { %s1711_s20 = smov 64   ;;  %s1712_s21 = smov 4  }
  0x31   : > { %s2181_s10 = sld [smem:[#allocation26_spill]]  ;;  %s45_s29 = sadd.s32 1, %s1699_s17 }
  0x32   : > { %p46_p9 = scmp.ge.s32.totalorder %s45_s29, 2  ;;  %s48_s30 = sadd.s32 1, %s1703_s18 }
  0x33   : > { %s57_s13 = sadd.s32 1, %s1687_s14  ;;  %p64_p11 = scmp.ne.s32.totalorder %s1687_s14, %s1683_s0 }
  0x34   : > { %s2210_s29 = smov (%p46_p9, %s45_s29), 0  ;;  %s2212_s30 = smov (!%p46_p9, %s48_s30), %s1703_s18 }
  0x35   : > { %2182 = sst [smem:[#allocation19_spill]] %s2210_s29  ;;  %s53_s12 = ssub.s32 %s1699_s17, %s2210_s29 }
  0x36   : > { %p65_p12 = scmp.eq.s32.totalorder %s1707_s19, 0  ;;  %p50_p0 = scmp.ge.s32.totalorder %s2212_s30, 2 }
  0x37   : > { %1413 = dma.hbm_to_vmem [thread:$0]  (!%p1411_p1), %s2181_s10, 1024, %s377_s28, [#allocation10], %s1711_s20, %s1711_s20, %s1712_s21  }
  0x38   : > { %p1886_p2 = por %p1846_p7, %p64_p11  ;;  %p1890_p1 = por %p65_p12, %p64_p11 }
  0x39   : > { %p1423_p3 = scmp.lt.s32.totalorder %s1707_s19, 4  ;;  %s2214_s30 = smov (%p50_p0, %s2212_s30), 0 }
  0x3a   : > { %s2183_s25 = scalar_select %p1886_p2, 1, 0 }
  0x3b   : > { %s396_s20 = sand.u32 1, %s1687_s14   ;;  %s1254_s21 = sshll.u32 %s1699_s17, 1 }
  0x3c   : > { %2184 = sst [smem:[#allocation20_spill]] %s2183_s25  ;;  %s52_s27 = ssub.s32 %s1703_s18, %s2214_s30 }
  0x3d   : > { %s54_s10 = sor.u32 %s53_s12, %s52_s27  ;;  %s1253_s29 = sshll.u32 %s396_s20, 4 }
  0x3e   : > { %p55_p4 = scmp.eq.s32.totalorder %s54_s10, 0  ;;  %s1255_s23 = sshll.u32 %s1703_s18, 2 }
  0x3f   : > { %s400_s11 = scalar_lea.vmem [#allocation6], %s1253_s29  ;;  %s406_s8 = sadd.s32 %s1255_s23, %s1254_s21 }
  0x40   : > { %s409_s9 = sshll.u32 %s400_s11, 4  ;;  %s1256_s6 = sshll.u32 %s406_s8, 7  ;;  %s410_s9 = int_to_ptr.vmem [resolvable:$true] %s409_s9 }
  0x41   : > { %s1903_s25 = scalar_select %p55_p4, %s1687_s14, %s57_s13  }
  0x42   : > { %p1909_p7 = pnand %p1423_p3, %p1890_p1  ;;  %s408_s12 = scalar_lea.hbm %s2142_s1, %s1256_s6 }
  0x43   : > { %s397_s10 = scalar_lea.sflag [#allocation7], %s396_s20  ;;  %s1590_s11 = scalar_lea.vmem %s410_s9, 256 }
  0x44   : > { %p1579_p5 = pneg %p1909_p7  ;;  %p1591_p8 = scmp.ne.s32.totalorder %s410_s9, %s1590_s11 }
  0x45   : > { %s1713_s13 = smov [#allocation6]  }
  0x46   : > { %p1593_p10 = pnand %p1591_p8, %p1579_p5  ;;  %s1595_s8 = sshll.u32 %s1713_s13, 4  ;;  %s1596_s8 = int_to_ptr.vmem [resolvable:$false] %s1595_s8 }
  0x47   : > { %s1597_s29 = scalar_lea.vmem %s1596_s8, 512  ;;  %p1598_p11 = scmp.lt.s32.totalorder %s410_s9, %s1596_s8 }
  0x48   : > { %p1594_p9 = pneg %p1593_p10  ;;  %p1599_p12 = scmp.lt.s32.totalorder %s1597_s29, %s1590_s11 }
  0x4a   : > { %p1600_p0 = por %p1599_p12, %p1598_p11 }
  0x4c   : > { %p1601_p1 = pnand %p1600_p0, %p1594_p9 }
  0x4e   : > { %1604 = shalt.err (!%p1601_p1)
}
  0x4f   : > { %s1714_s28 = smov 128   ;;  %s1715_s7 = smov 8  }
  0x50   : > { %1417 = dma.hbm_to_vmem [thread:$0]  (!%p1909_p7), %s408_s12, 256, %s410_s9, %s397_s10, %s1714_s28, %s1714_s28, %s1715_s7  }
  0x51   : > { %421 = sbr.rel (%p1862_p13) target bundleno = 1256 (0x4e8), region = 68  ;;  %s1923_s6 = sand.u32 (!%p1862_p13), 1, %s1683_s0  }
  0x52   : > { %s1258_s17 = sshll.u32 (!%p1862_p13), %s1923_s6, 4  ;;  %s424_s20 = scalar_lea.sflag (!%p1862_p13), [#allocation7], %s1923_s6 }
  0x53   : > { %s1927_s21 = scalar_lea.vmem (!%p1862_p13), [#allocation6], %s1258_s17  ;;  %p2187_p3 = scmp.ne.s32.totalorder (!%p1862_p13), %s2177_s24, 0 }
  0x56   : > { %1666 = dma.done.wait (%p2187_p3), %s424_s20, 256  }
  0x57   : > { %1668 = vsyncadd (%p2187_p3), %s424_s20, 4294967040 }
  0x58   : > { %1670 = dma.done.wait (%p1842_p6), [#allocation10], 1024  }
  0x59   : > { %1672 = vsyncadd (%p1842_p6), [#allocation10], 4294966272  ;;  %s1260_s5 = sshll.u32 %s1923_s6, 3  ;;  %s1939_s9 = sld [smem:[#allocation5 + %s1695_s16]] }
  0x5a   : > { %s1941_s26 = scalar_lea.vmem [#allocation11], %s1260_s5  ;;  %p1261_p13 = scmp.ne.s32.totalorder %s1691_s15, 0 }
  0x5c   : > { %479 = sbr.rel (%p1261_p13) target bundleno = 100 (0x64), region = 80 }
  0x61   : > { %vm480_vm0 = vcmask 257024   ;;  %vm483_vm1 = vcmask 519168   ;;  %v1716_v0 = vmov 0  }
  0x62   : > { %482 = vst.msk [vmem:[#allocation2 + $0x4] sm:$0xf] %vm480_vm0, %v1716_v0 }
  0x63   : > { %485 = vst.msk [vmem:[#allocation3 + $0x4] sm:$0xf] %vm483_vm1, %v1716_v0 }
  0x64 PF: > { %s1945_s22 = sshll.u32 %s1691_s15, 4  ;;  %s487_s24 = sadd.s32 4, %s1939_s9 }
  0x65   : > { %p1263_p6 = scmp.ge.s32.totalorder %s1945_s22, %s487_s24 }
  0x66   : > { %s1719_s8 = smov (!%p1263_p6), 64   ;;  %s1720_s29 = smov (!%p1263_p6), 32  }
  0x67   : > { %492 = sbr.rel (%p1263_p6) target bundleno = 1212 (0x4bc), region = 84  ;;  %s2188_s17 = sld [smem:[#allocation23_spill]] (!%p1263_p6) }
  0x68   : > { %s2190_s7 = sld [smem:[#allocation21_spill]] (!%p1263_p6) }
  0x69   : > { %s2191_s5 = sld [smem:[#allocation22_spill]] (!%p1263_p6) }
  0x6a   : > { %s2192_s10 = sld [smem:[#allocation24_spill]] (!%p1263_p6) }
  0x6c   : > { %v1504_v1 = vld [vmem:[%s2143_s2 + $0x10] ss:$0 sps:$4 sm:$0xff]   ;;  %vm527_vm2 = vcmask 1043456   ;;  %v1717_v2 = vmov 0.0   ;;  %vm1718_vm3 = vmmov 0   ;;  %v1505_v4 = vld [vmem:[%s2143_s2 + $0x8] sm:$0xff]   ;;  %v574_v12 = vlaneseq }
  0x6d   : > { %1356 = vmatprep.subr.bf16.mxu0 %v1717_v2  ;;  %1366 = vmatprep.subr.bf16.mxu1 %v1717_v2  ;;  %v529_v3 = vsel %vm527_vm2, %v1504_v1, 0  ;;  %vm523_vm4 = vcmask 326656   ;;  %v1506_v5 = vld [vmem:[%s2143_s2] sm:$0xff]   ;;  %v494_v7 = vld [vmem:[%s1927_s21 + $0x8] sm:$0xff]  ;;  %v577_v14 = vstv %s1945_s22  ;;  %v580_v18 = vstv %s1939_s9  ;;  %s2189_s20 = smov %s2188_s17 }
  0x6e   : > { %1362 = vmatprep.mubr.msk.bf16.mxu0 %vm1718_vm3, %v1717_v2  ;;  %1378 = vmatprep.mubr.msk.bf16.mxu1 %vm1718_vm3, %v1717_v2  ;;  %v493_v6 = vld [vmem:[%s1927_s21] sm:$0xff]  ;;  %v1509_v9 = vld [vmem:[%s2145_s4 + $0x28] sm:$0xff]   ;;  %v1511_v11 = vld [vmem:[%s2145_s4 + $0x18] sm:$0xff]   ;;  %v575_v13 = vshrl.u32 %v574_v12, 7  ;;  %vm597_vm6 = vcmask 257024   ;;  %vm1111_vm8 = vcmask 257027  }
  0x6f   : > { %1357 = vmatpush3.bf16.msra.mxu0 %v529_v3  ;;  %v495_v8 = vpack.c.bf16 %v494_v7, %v493_v6  ;;  %1367 = vmatpush3.bf16.msra.mxu1 %v1509_v9  ;;  %v1510_v10 = vld [vmem:[%s2145_s4 + $0x20] sm:$0xff]   ;;  %v1512_v33 = vld [vmem:[%s2145_s4 + $0x10] sm:$0xff]   ;;  %v1513_v34 = vld [vmem:[%s2145_s4 + $0x8] sm:$0xff]   ;;  %vm615_vm9 = vsmask.f32 7424  ;;  %vm639_vm10 = vcmask 261120  }
  0x70   : > { %1358 = vmatprep.subr.bf16.mxu0 %v1717_v2  ;;  %1368 = vmatprep.subr.bf16.mxu1 %v1717_v2  ;;  %v1264_v15 = vld [vmem:[%s2144_s3] ss:$0 sm:$0xff]  ;;  %v578_v16 = vadd.s32 %v577_v14, %v575_v13  ;;  %v576_v17 = vadd.s32 8, %v575_v13  ;;  %v600_v31 = vld [vmem:[#allocation2 + $0x4] sm:$0x8]  ;;  %vm645_vm11 = vcmask 523264  }
  0x71   : > { %v1515_v39 = vld [vmem:[%s2145_s4] sm:$0xff]   ;;  %vm663_vm12 = vcmask 1044480   ;;  %vm703_vm13 = vcmask 785408   ;;  %v1518_v62 = vld [vmem:[%s2188_s17 + $0x38] sm:$0xff]   ;;  %v1721_v63 = vmov 0   ;;  %v1519_v0 = vld [vmem:[%s2189_s20 + $0x30] sm:$0xff]  }
  0x72   : > { %vm581_vm5 = vcmp.lt.s32.totalorder %v578_v16, %v580_v18  ;;  %v579_v22 = vadd.s32 %v577_v14, %v576_v17  ;;  %v1520_v1 = vld [vmem:[%s2189_s20 + $0x28] sm:$0xff]   ;;  %v1521_v3 = vld [vmem:[%s2189_s20 + $0x20] sm:$0xff]   ;;  %v1527_v9 = vld [vmem:[%s2189_s20 + $0x50] sm:$0xff]   ;;  %vm776_vm14 = vcmask 519168   ;;  %vm1113_vm15 = vcmask 519171   ;;  %s2194_s17 = sld [smem:[#allocation27_spill]] }
  0x73   : > { %1359 = vmatpush3.bf16.msra.mxu0 %v1505_v4  ;;  %1369 = vmatpush3.bf16.msra.mxu1 %v1510_v10  ;;  %v1522_v4 = vld [vmem:[%s2189_s20 + $0x18] sm:$0xff]   ;;  %v1524_v6 = vld [vmem:[%s2189_s20 + $0x8] sm:$0xff]   ;;  %v1525_v7 = vld [vmem:[%s2189_s20] sm:$0xff]  }
  0x74   : > { %1360 = vmatprep.subr.bf16.mxu0 %v1717_v2  ;;  %1370 = vmatprep.subr.bf16.mxu1 %v1717_v2  ;;  %vm582_vm7 = vcmp.lt.s32.totalorder %v579_v22, %v580_v18  ;;  %v1528_v10 = vld [vmem:[%s2189_s20 + $0x48] sm:$0xff]   ;;  %v1283_v13 = vld [vmem:[%s2191_s5] ss:$0 sm:$0xff] }
  0x77   : > { %1361 = vmatpush3.bf16.msra.mxu0 %v1506_v5  ;;  %1371 = vmatpush3.bf16.msra.mxu1 %v1511_v11  ;;  %v1523_v5 = vld [vmem:[%s2189_s20 + $0x10] sm:$0xff]   ;;  %v1282_v11 = vld [vmem:[%s2190_s7] ss:$0 sm:$0xff] }
  0x78   : > { %1372 = vmatprep.subr.bf16.mxu1 %v1717_v2  ;;  %927 = vmatprep.subr.bf16.mxu0 %v1721_v63 }
  0x7a   : > { %1363 = vmatmul.mubr.msk.bf16.vlgmr.msra.gmra.mxu0 %vm523_vm4, %v495_v8  ;;  %v1526_v8 = vld [vmem:[%s2189_s20 + $0x58] sm:$0xff]  }
  0x7b   : > { %1373 = vmatpush3.bf16.msra.mxu1 %v1512_v33  ;;  %928 = vmatpush1.bf16.msra.mxu0 %v1518_v62 }
  0x7c   : > { %1374 = vmatprep.subr.bf16.mxu1 %v1717_v2  ;;  %929 = vmatprep.subr.bf16.mxu0 %v1721_v63 }
  0x7f   : > { %1375 = vmatpush3.bf16.msra.mxu1 %v1513_v34  ;;  %930 = vmatpush1.bf16.msra.mxu0 %v1519_v0 }
  0x80   : > { %1376 = vmatprep.subr.bf16.mxu1 %v1717_v2  ;;  %931 = vmatprep.subr.bf16.mxu0 %v1721_v63 }
  0x83   : > { %1377 = vmatpush3.bf16.msra.mxu1 %v1515_v39  ;;  %932 = vmatpush1.bf16.msra.mxu0 %v1520_v1 }
  0x84   : > { %1382 = vmatprep.subr.bf16.mxu1 %v1717_v2  ;;  %933 = vmatprep.subr.bf16.mxu0 %v1721_v63 }
  0x87   : > { %934 = vmatpush1.bf16.msra.mxu0 %v1521_v3 }
  0x88   : > { %935 = vmatprep.subr.bf16.mxu0 %v1721_v63 }
  0x8b   : > { %936 = vmatpush1.bf16.msra.mxu0 %v1522_v4 }
  0x8c   : > { %937 = vmatprep.subr.bf16.mxu0 %v1721_v63 }
  0x8f   : > { %938 = vmatpush1.bf16.msra.mxu0 %v1523_v5 }
  0x90   : > { %939 = vmatprep.subr.bf16.mxu0 %v1721_v63 }
  0x93   : > { %940 = vmatpush1.bf16.msra.mxu0 %v1524_v6 }
  0x94   : > { %941 = vmatprep.subr.bf16.mxu0 %v1721_v63 }
  0x97   : > { %942 = vmatpush1.bf16.msra.mxu0 %v1525_v7  ;;  %v1306_v7 = vld [vmem:[%s2194_s17] ss:$0 sm:$0xff] }
  0x98   : > { %951 = vmatprep.subr.bf16.mxu0 %v1721_v63 }
  0x9b   : > { %952 = vmatpush2.bf16.msra.mxu0 %v1526_v8 }
  0x9c   : > { %953 = vmatprep.subr.bf16.mxu0 %v1721_v63 }
  0x9f   : > { %954 = vmatpush2.bf16.msra.mxu0 %v1527_v9 }
  0xa0   : > { %955 = vmatprep.subr.bf16.mxu0 %v1721_v63 }
  0xa3   : > { %956 = vmatpush2.bf16.msra.mxu0 %v1528_v10 }
  0xa4   : > { %957 = vmatprep.subr.bf16.mxu0 %v1721_v63 }
 0x13a   : > { %v565_v19 = vpop.f32.mrf.mxu0 }
 0x13b   : > { %v566_v20 = vadd.f32 %v1264_v15, %v565_v19 }
 0x13c   : > { %v1364_v21 = vpop.f32.mrf.mxu0 }
 0x13d   : > { %v572_v23 = vmax.f32 %v566_v20, 0.0 }
 0x13e   : > { %v568_v24 = vpop.f32.mrf.mxu0 }
 0x13f   : > { %v587_v25 = vsel %vm581_vm5, %v572_v23, 0.0  ;;  %v569_v26 = vadd.f32 %v1264_v15, %v568_v24  ;;  %v779_v24 = vld [vmem:[#allocation3 + $0x4] sm:$0x8] }
 0x140   : > { %v1325_v27 = vpack.c.bf16 %v587_v25, %v587_v25  ;;  %v1365_v28 = vpop.f32.mrf.mxu0 }
 0x141   : > { %v573_v29 = vmax.f32 %v569_v26, 0.0 }
 0x142   : > { %598 = vst.msk [vmem:[#allocation2 + $0x8] sm:$0xf] %vm597_vm6, %v1325_v27  ;;  %v1530_v27 = vld [vmem:[%s2189_s20 + $0x40] sm:$0xff]  }
 0x143   : > { %v588_v30 = vsel %vm582_vm7, %v573_v29, 0.0  ;;  %958 = vmatpush2.bf16.msra.mxu0 %v1530_v27 }
 0x144   : > { %v1326_v32 = vpack.c.bf16 %v588_v30, %v588_v30 }
 0x146   : > { %599 = vst.msk [vmem:[#allocation2 + $0xc] sm:$0xf] %vm597_vm6, %v1326_v32 }
 0x147   : > { %1112 = vst.msk [vmem:[#allocation2 + $0x4] sm:$0x8] %vm1111_vm8, %v1326_v32 }
 0x149   : > { %v601_v35 = vld [vmem:[#allocation2 + $0x8] sm:$0xf] }
 0x14a   : > { %v1271_v36 = vcombine.low %v600_v31, %v601_v35  ;;  %v1531_v31 = vld [vmem:[#allocation9 + $0x38] sm:$0xff]  }
 0x14c   : > { %v619_v37 = vshll.u32 %v1271_v36, 16  ;;  %v617_v44 = vshrl.u32 %v1271_v36, 16 }
 0x14d   : > { %v603_v38 = vld [vmem:[#allocation2 + $0xc] sm:$0xf] }
 0x14e   : > { %v1274_v40 = vcombine.low %v601_v35, %v603_v38  ;;  %v1273_v41 = vcombine.low %v603_v38, %v603_v38  ;;  %v621_v42 = vrot.slane %v619_v37, 1  ;;  %v1514_v54 = vld [vmem:[#allocation2 + $0xc] ss:$0 sps:$4 sm:$0x77]   ;;  %v1532_v35 = vld [vmem:[#allocation9 + $0x30] sm:$0xff]  }
 0x150   : > { %v636_v43 = vrot.slane %v1274_v40, 5  ;;  %v624_v45 = vshll.u32 %v1273_v41, 16  ;;  %v622_v46 = vor.u32 %v621_v42, %v617_v44  ;;  %v628_v49 = vshrl.u32 %v1273_v41, 16  ;;  %v1533_v41 = vld [vmem:[#allocation9 + $0x28] sm:$0xff]   ;;  %v1534_v44 = vld [vmem:[#allocation9 + $0x20] sm:$0xff]  }
 0x152   : > { %637 = vrot.lane.b32.xlu1 %v636_v43, %s1719_s8  ;;  %v626_v47 = vrot.slane %v624_v45, 1  ;;  %v1535_v45 = vld [vmem:[#allocation9 + $0x18] sm:$0xff]  }
 0x154   : > { %v627_v48 = vsel %vm615_vm9, %v622_v46, %v626_v47  ;;  %v630_v50 = vor.u32 %v628_v49, %v626_v47 }
 0x155   : > { %631 = vrot.lane.b32.xlu0 %v627_v48, %s1720_s29 }
 0x159   : > { %633 = vrot.lane.b32.xlu0 %v630_v50, %s1720_s29  ;;  %s2193_s29 = sld [smem:[#allocation25_spill]] }
 0x1c4   : > { %v638_v53 = vpop.permute.xlu1 %637 }
 0x1c7   : > { %v632_v51 = vpop.permute.xlu0 %631 }
 0x1c8   : > { %v641_v52 = vsel %vm639_vm10, %v1271_v36, %v632_v51 }
 0x1c9   : > { %v647_v55 = vsel %vm645_vm11, %v641_v52, %v638_v53 }
 0x1ca   : > { %v664_v59 = vrot.slane %v647_v55, 3  ;;  %v1537_v55 = vld [vmem:[#allocation9 + $0x8] sm:$0xff]  }
 0x1cb   : > { %v634_v56 = vpop.permute.xlu0 %633 }
 0x1cc   : > { %v644_v57 = vsel %vm639_vm10, %v1514_v54, %v634_v56  ;;  %v1536_v54 = vld [vmem:[#allocation9 + $0x10] sm:$0xff]   ;;  %v1538_v56 = vld [vmem:[#allocation9] sm:$0xff]  }
 0x1cd   : > { %v648_v58 = vsel %vm645_vm11, %v644_v57, %v638_v53  ;;  %v1304_v57 = vld [vmem:[%s2192_s10] ss:$0 sm:$0xff] }
 0x1ce   : > { %v665_v60 = vrot.slane %v648_v58, 3 }
 0x1d0   : > { %v666_v61 = vsel %vm663_vm12, %v664_v59, %v665_v60  ;;  %v1305_v60 = vld [vmem:[%s2193_s29] ss:$0 sm:$0xff] }
 0x1d1   : > { %1379 = vmatmul.mubr.msk.bf16.vlgmr.msra.gmra.mxu1 %vm703_vm13, %v666_v61 }
 0x1d2   : > { %1398 = vmatprep.mubr.msk.bf16.mxu1 %vm1718_vm3, %v1717_v2  ;;  %1383 = vmatpush3.bf16.msra.mxu1 %v1531_v31 }
 0x1d3   : > { %1384 = vmatprep.subr.bf16.mxu1 %v1717_v2 }
 0x1d6   : > { %1385 = vmatpush3.bf16.msra.mxu1 %v1532_v35 }
 0x1d7   : > { %1386 = vmatprep.subr.bf16.mxu1 %v1717_v2 }
 0x1da   : > { %1387 = vmatpush3.bf16.msra.mxu1 %v1533_v41 }
 0x1db   : > { %1388 = vmatprep.subr.bf16.mxu1 %v1717_v2 }
 0x1de   : > { %1389 = vmatpush3.bf16.msra.mxu1 %v1534_v44 }
 0x1df   : > { %1390 = vmatprep.subr.bf16.mxu1 %v1717_v2 }
 0x1e2   : > { %1391 = vmatpush3.bf16.msra.mxu1 %v1535_v45 }
 0x1e3   : > { %1392 = vmatprep.subr.bf16.mxu1 %v1717_v2 }
 0x1e6   : > { %1393 = vmatpush3.bf16.msra.mxu1 %v1536_v54 }
 0x1e7   : > { %1394 = vmatprep.subr.bf16.mxu1 %v1717_v2 }
 0x1ea   : > { %1395 = vmatpush3.bf16.msra.mxu1 %v1537_v55 }
 0x1eb   : > { %1396 = vmatprep.subr.bf16.mxu1 %v1717_v2 }
 0x1ee   : > { %1397 = vmatpush3.bf16.msra.mxu1 %v1538_v56 }
 0x291   : > { %v741_v12 = vpop.f32.mrf.mxu1 }
 0x292   : > { %v755_v14 = vmul.f32 %v1282_v11, %v741_v12 }
 0x293   : > { %v1380_v15 = vpop.f32.mrf.mxu1 }
 0x294   : > { %v764_v16 = vadd.f32 %v1283_v13, %v755_v14 }
 0x295   : > { %v744_v17 = vpop.f32.mrf.mxu1 }
 0x296   : > { %v766_v18 = vmax.f32 %v764_v16, 0.0  ;;  %v756_v19 = vmul.f32 %v1282_v11, %v744_v17 }
 0x297   : > { %v1381_v20 = vpop.f32.mrf.mxu1 }
 0x298   : > { %v1327_v21 = vpack.c.bf16 %v766_v18, %v766_v18  ;;  %v765_v22 = vadd.f32 %v1283_v13, %v756_v19 }
 0x29a   : > { %777 = vst.msk [vmem:[#allocation3 + $0x8] sm:$0xf] %vm776_vm14, %v1327_v21  ;;  %v767_v23 = vmax.f32 %v765_v22, 0.0 }
 0x29c   : > { %v1328_v25 = vpack.c.bf16 %v767_v23, %v767_v23 }
 0x29e   : > { %778 = vst.msk [vmem:[#allocation3 + $0xc] sm:$0xf] %vm776_vm14, %v1328_v25 }
 0x29f   : > { %1114 = vst.msk [vmem:[#allocation3 + $0x4] sm:$0x8] %vm1113_vm15, %v1328_v25 }
 0x2a1   : > { %v780_v26 = vld [vmem:[#allocation3 + $0x8] sm:$0xf] }
 0x2a2   : > { %v1286_v28 = vcombine.low %v779_v24, %v780_v26 }
 0x2a4   : > { %v797_v29 = vshll.u32 %v1286_v28, 16  ;;  %v795_v36 = vshrl.u32 %v1286_v28, 16 }
 0x2a5   : > { %v782_v30 = vld [vmem:[#allocation3 + $0xc] sm:$0xf] }
 0x2a6   : > { %v1289_v32 = vcombine.low %v780_v26, %v782_v30  ;;  %v1288_v33 = vcombine.low %v782_v30, %v782_v30  ;;  %v799_v34 = vrot.slane %v797_v29, 1  ;;  %v1529_v47 = vld [vmem:[#allocation3 + $0xc] ss:$0 sps:$4 sm:$0x77]  }
 0x2a8   : > { %1303 = vmatprep.mubr.msk.bf16.mxu0 %vm645_vm11, %v1289_v32  ;;  %v802_v37 = vshll.u32 %v1288_v33, 16  ;;  %v800_v38 = vor.u32 %v799_v34, %v795_v36  ;;  %v806_v40 = vshrl.u32 %v1288_v33, 16 }
 0x2aa   : > { %v804_v39 = vrot.slane %v802_v37, 1 }
 0x2ac   : > { %v805_v42 = vsel %vm615_vm9, %v800_v38, %v804_v39  ;;  %v808_v43 = vor.u32 %v806_v40, %v804_v39 }
 0x2ad   : > { %809 = vrot.lane.b32.xlu1 %v805_v42, %s1719_s8 }
 0x2ae   : > { %811 = vrot.lane.b32.xlu0 %v808_v43, %s1719_s8 }
 0x31f   : > { %v810_v46 = vpop.permute.xlu1 %809 }
 0x320   : > { %v816_v48 = vsel %vm645_vm11, %v1286_v28, %v810_v46  ;;  %v812_v49 = vpop.permute.xlu0 %811 }
 0x321   : > { %v846_v50 = vrot.slane %v816_v48, 3  ;;  %v819_v51 = vsel %vm645_vm11, %v1529_v47, %v812_v49 }
 0x322   : > { %v847_v52 = vrot.slane %v819_v51, 3 }
 0x324   : > { %v848_v53 = vsel %vm663_vm12, %v846_v50, %v847_v52 }
 0x325   : > { %960 = vmatmul.mubr.bf16.vlgmr.msra.gmra.mxu0 %v848_v53 }
 0x3e5   : > { %v961_v58 = vpop.f32.mrf.mxu0 }
 0x3e6   : > { %v975_v59 = vmul.f32 %v1304_v57, %v961_v58 }
 0x3e7   : > { %v963_v61 = vpop.f32.mrf.mxu0 }
 0x3e8   : > { %v984_v63 = vadd.f32 %v1305_v60, %v975_v59 }
 0x3e9   : > { %v964_v62 = vpop.f32.mrf.mxu0 }
 0x3ea   : > { %v976_v0 = vmul.f32 %v1304_v57, %v964_v62  ;;  %v986_v2 = vmax.f32 %v984_v63, 0.0 }
 0x3eb   : > { %v966_v1 = vpop.f32.mrf.mxu0 }
 0x3ec   : > { %v985_v3 = vadd.f32 %v1305_v60, %v976_v0 }
 0x3ee   : > { %v987_v4 = vmax.f32 %v985_v3, 0.0 }
 0x3f0   : > { %v988_v5 = vpack.c.bf16 %v987_v4, %v986_v2 }
 0x3f2   : > { %1399 = vmatmul.mubr.bf16.vlgmr.msra.gmra.mxu1 %v988_v5 }
 0x4b2   : > { %v1094_v6 = vpop.f32.mrf.mxu1 }
 0x4b3   : > { %v1095_v10 = vadd.f32 %v1306_v7, %v1094_v6 }
 0x4b4   : > { %v1400_v8 = vpop.f32.mrf.mxu1 }
 0x4b6   : > { %v1097_v9 = vpop.f32.mrf.mxu1 }
 0x4b7   : > { %v1098_v11 = vadd.f32 %v1306_v7, %v1097_v9 }
 0x4b8   : > { %v1401_v12 = vpop.f32.mrf.mxu1 }
 0x4b9   : > { %v1334_v13 = vpack.c.bf16 %v1098_v11, %v1095_v10 }
 0x4bb   : > { %1335 = vst [vmem:[%s1941_s26] sm:$0xff] %v1334_v13  }
 0x4bc PF: > { %p1317_p4 = scmp.lt.s32.totalorder %s1945_s22, %s487_s24 }
 0x4bd   : > { %s2195_s27 = sld [smem:[#allocation28_spill]] (!%p1317_p4) }
 0x4be   : > { %1117 = sbr.rel (%p1317_p4) target bundleno = 1230 (0x4ce), region = 88 }
 0x4c3   : > { %v1118_v14 = vld [vmem:[%s2195_s27] sm:$0x1]  ;;  %v1122_v15 = vlaneseq }
 0x4c4   : > { %v1120_v16 = vpack.i.b16 %v1118_v14, %v1118_v14 }
 0x4c5   : > { %v1123_v17 = vshrl.u32 %v1122_v15, 7 }
 0x4c7   : > { %v1124_v18 = vsub.s32 0, %v1123_v17 }
 0x4c9   : > { %v1125_v19 = vrot.slane %v1120_v16, %v1124_v18 }
 0x4cb   : > { %v1318_v20 = vcombine.low %v1125_v19, %v1125_v19 }
 0x4cd   : > { %1130 = vst [vmem:[%s1941_s26] sm:$0xf] %v1318_v20  ;;  %1131 = vst [vmem:[%s1941_s26 + $0x4] sm:$0xf] %v1318_v20 }
 0x4ce PF: > { %s1320_s22 = sshll.u32 %s1691_s15, 1  ;;  %s1321_s24 = sshll.u32 %s1695_s16, 2 }
 0x4cf   : > { %s1148_s23 = sshll.u32 %s1941_s26, 4  ;;  %s1145_s8 = sadd.s32 %s1321_s24, %s1320_s22  ;;  %s2083_s23 = int_to_ptr.vmem [resolvable:$true] %s1148_s23 }
 0x4d0   : > { %s1322_s12 = sshll.u32 %s1145_s8, 6  ;;  %s2197_s13 = sld [smem:[#allocation29_spill]] }
 0x4d1   : > { %s1133_s28 = scalar_lea.sflag [#allocation8], %s1923_s6  ;;  %s1605_s7 = scalar_lea.vmem %s2083_s23, 128 }
 0x4d2   : > { %p1606_p7 = scmp.ne.s32.totalorder %s2083_s23, %s1605_s7  ;;  %s1722_s15 = smov [#allocation11]  }
 0x4d3   : > { %s1609_s16 = sshll.u32 %s1722_s15, 4  ;;  %s1610_s16 = int_to_ptr.vmem [resolvable:$false] %s1609_s16 }
 0x4d4   : > { %p1607_p5 = pnand %p1606_p7, %p1886_p2  ;;  %s1611_s26 = scalar_lea.vmem %s1610_s16, 256 }
 0x4d5   : > { %p1612_p10 = scmp.lt.s32.totalorder %s2083_s23, %s1610_s16  ;;  %p1613_p9 = scmp.lt.s32.totalorder %s1611_s26, %s1605_s7 }
 0x4d6   : > { %s2088_s29 = scalar_lea.hbm %s2197_s13, %s1322_s12  ;;  %p1608_p8 = pneg %p1607_p5 }
 0x4d7   : > { %p1614_p11 = por %p1613_p9, %p1612_p10 }
 0x4d9   : > { %p1615_p12 = pnand %p1614_p11, %p1608_p8 }
 0x4db   : > { %1618 = shalt.err (!%p1615_p12)
}
 0x4dc   : > { %s1619_s17 = scalar_lea.hbm %s2088_s29, 128  ;;  %s1623_s27 = scalar_lea.hbm %s2197_s13, 512 }
 0x4dd   : > { %p1620_p0 = scmp.ne.s32.totalorder %s2088_s29, %s1619_s17  ;;  %p1624_p13 = scmp.lt.s32.totalorder %s2088_s29, %s2197_s13 }
 0x4de   : > { %p1625_p6 = scmp.lt.s32.totalorder %s1623_s27, %s1619_s17 }
 0x4df   : > { %p1621_p1 = pnand %p1620_p0, %p1886_p2 }
 0x4e0   : > { %p1626_p4 = por %p1625_p6, %p1624_p13 }
 0x4e1   : > { %p1622_p3 = pneg %p1621_p1 }
 0x4e3   : > { %p1627_p7 = pnand %p1626_p4, %p1622_p3 }
 0x4e5   : > { %1630 = shalt.err (!%p1627_p7)
}
 0x4e6   : > { %s1723_s8 = smov 64   ;;  %s1724_s12 = smov 4  }
 0x4e7   : > { %1408 = dma.vmem_to_hbm [thread:$0]  (%p1886_p2), %s2083_s23, 128, %s2088_s29, %s1133_s28, %s1723_s8, %s1723_s8, %s1724_s12  }
 0x4e8 PF: > { %s2198_s10 = sld [smem:[#allocation16_spill]]  ;;  %p1425_p5 = scmp.ge.s32.totalorder %s1707_s19, 2 }
 0x4e9   : > { %s2199_s11 = sld [smem:[#allocation18_spill]] }
 0x4ee   : > { %s1163_s7 = sand.u32 1, %s2198_s10  }
 0x4ef   : > { %p2200_p8 = scmp.ne.s32.totalorder %s2199_s11, 0  ;;  %s1164_s15 = scalar_lea.sflag [#allocation8], %s1163_s7 }
 0x4f1   : > { %p1419_p10 = pnand %p1425_p5, %p2200_p8 }
 0x4f3   : > { %p1420_p9 = pneg %p1419_p10 }
 0x4f5   : > { %1674 = dma.done.wait (%p1420_p9), %s1164_s15, 128  }
 0x4f6   : > { %1676 = vsyncadd (%p1420_p9), %s1164_s15, 4294967168  ;;  %s36_s19 = sadd.s32 1, %s1707_s19   ;;  %s2201_s15 = sld [smem:[#allocation17_spill]] }
 0x4f7   : > { %p33_p11 = scmp.ge.s32.totalorder %s36_s19, 6   ;;  %s2202_s17 = sld [smem:[#allocation19_spill]] }
 0x4f8   : > { %s2203_s6 = smov %s2214_s30  ;;  %s2204_s30 = smov %s1683_s0 }
 0x4f9   : > { %s2205_s0 = smov %s1687_s14  ;;  %s2206_s14 = smov %s1903_s25 }
 0x4fa   : > { %s2207_s16 = smov %s1703_s18  ;;  %s2208_s18 = smov %s2203_s6 }
 0x4fb   :  { %35 = sbr.rel (!%p33_p11) target bundleno = 25 (0x19), region = 129 }
 0x500   :  { %1169 = vsyncpa [#allocation7], 1 }
 0x501   :  { %1171 = vsyncpa [#allocation7 + $0x1], 1 }
 0x502   :  { %1172 = vsyncpa [#allocation10], 1 }
 0x503   :  { %1173 = vsyncpa [#allocation8], 1 }
 0x504   :  { %1175 = vsyncpa [#allocation8 + $0x1], 1 }

</bundles_post_ra>
